<compile_context>
chip_gen: v7x
topology: tpu7x:2x2x1
jax: 0.10.0
libtpu: 0.0.40
codegen_flags: <defaults>
</compile_context>

<pallas_src>
import jax
import jax.numpy as jnp
from jax.experimental import pallas as pl
from jax.experimental.pallas import tpu as pltpu

_EPS = 1e-5


# ----------------------------------------------------------------------------
# Kernels
# ----------------------------------------------------------------------------
def _conv3x3_acc(src_ref, w_ref):
    """3x3 'same' conv as 9 per-tap MXU matmuls with f32 accumulation.

    src_ref: (NB, H+2, W+2, Cp) bf16 ref with a zero 1-pixel halo.
    w_ref:   (9, Cp, Cp) bf16 ref, tap-major [tap, Cin, Cout].
    Returns  (NB*H*W, Cp) f32.
    """
    NB, Hp2, Wp2, Cp = src_ref.shape
    H, W = Hp2 - 2, Wp2 - 2
    acc = None
    for dy in range(3):
        for dx in range(3):
            tap = src_ref[:, dy:dy + H, dx:dx + W, :].reshape(NB * H * W, Cp)
            part = jnp.dot(tap, w_ref[dy * 3 + dx],
                           preferred_element_type=jnp.float32)
            acc = part if acc is None else acc + part
    return acc


def _conv1_kernel(xpad_ref, w_ref, y_ref, st_ref):
    NB, H, W, Cp = y_ref.shape
    acc = _conv3x3_acc(xpad_ref, w_ref)                       # (NB*H*W, Cp) f32
    # BN partial statistics fused into the conv epilogue (acc still in vregs).
    st_ref[0, 0:1, :] = jnp.sum(acc, axis=0, keepdims=True)
    st_ref[0, 1:2, :] = jnp.sum(acc * acc, axis=0, keepdims=True)
    y_ref[...] = acc.reshape(NB, H, W, Cp)


def _conv2_kernel(y1_ref, w_ref, a_ref, y2_ref, st_ref, pad_ref):
    NB, H, W, Cp = y1_ref.shape
    # Zero ONLY the 1-pixel halo (4 thin strips); the interior is overwritten
    # below.  Done every grid step so it stays correct when the "parallel"
    # axis is sharded across TensorCores (each core has its own scratch).
    pad_ref[:, 0:1, :, :] = jnp.zeros((NB, 1, W + 2, Cp), pad_ref.dtype)
    pad_ref[:, H + 1:H + 2, :, :] = jnp.zeros((NB, 1, W + 2, Cp), pad_ref.dtype)
    pad_ref[:, :, 0:1, :] = jnp.zeros((NB, H + 2, 1, Cp), pad_ref.dtype)
    pad_ref[:, :, W + 1:W + 2, :] = jnp.zeros((NB, H + 2, 1, Cp), pad_ref.dtype)

    scale = a_ref[0:1, :]                                     # (1, Cp) f32
    shift = a_ref[1:2, :]
    y1 = y1_ref[...].reshape(NB * H * W, Cp)
    h = jnp.maximum(y1 * scale + shift, 0.0)                  # BN1 + ReLU (f32)
    pad_ref[:, 1:1 + H, 1:1 + W, :] = (
        h.reshape(NB, H, W, Cp).astype(pad_ref.dtype))

    acc = _conv3x3_acc(pad_ref, w_ref)
    st_ref[0, 0:1, :] = jnp.sum(acc, axis=0, keepdims=True)
    st_ref[0, 1:2, :] = jnp.sum(acc * acc, axis=0, keepdims=True)
    y2_ref[...] = acc.reshape(NB, H, W, Cp)


def _finalize_kernel(y2_ref, x_ref, a_ref, o_ref):
    scale = a_ref[0:1, :]
    shift = a_ref[1:2, :]
    o_ref[...] = jnp.maximum(y2_ref[...] * scale + shift + x_ref[...], 0.0)


# ----------------------------------------------------------------------------
# Wrapper helpers
# ----------------------------------------------------------------------------
def _round_up(v, m):
    return (v + m - 1) // m * m


def _vmem_capacity_bytes():
    try:
        return int(pltpu.get_tpu_info().vmem_capacity_bytes)
    except Exception:
        return 64 * 1024 * 1024


def _estimate_block_bytes(nb, H, W, Cp):
    act = nb * H * W * Cp
    return (2 * 4 * act                              # f32 input block, 2x buffered
            + 2 * 4 * act                            # f32 output block, 2x buffered
            + 2 * nb * (H + 2) * (W + 2) * Cp        # bf16 padded-activation scratch
            + 2 * 2 * 9 * Cp * Cp                    # bf16 weights, 2x buffered
            + 3 * 4 * act)                           # compiler temps (acc / h / tap)


def _pick_block_n(N, H, W, Cp, budget):
    for nb in sorted((d for d in range(1, N + 1) if N % d == 0), reverse=True):
        if _estimate_block_bytes(nb, H, W, Cp) <= budget // 2:
            return nb
    return 1


def _finalize_bn(stats, gamma, beta, count):
    """stats: (G, 2, Cp) per-block [sum, sum_sq] -> (2, Cp) [scale, shift]."""
    # TODO(synk): E[y^2]-E[y]^2 in f32 is cancellation-prone when |mean|>>std
    # at very large NHW; a shifted/two-pass variance would need another pass.
    s = jnp.sum(stats[:, 0, :], axis=0)
    ss = jnp.sum(stats[:, 1, :], axis=0)
    mean = s / count
    var = ss / count - mean * mean                   # biased variance (training BN)
    scale = gamma * jax.lax.rsqrt(var + _EPS)
    shift = beta - mean * scale
    return jnp.stack([scale, shift], axis=0).astype(jnp.float32)


# ----------------------------------------------------------------------------
# Public entry point (PyTorch NCHW interface)
# ----------------------------------------------------------------------------
def residual_block(x_nchw, w1, b1, w2, b2, gamma, beta, block_n=None):
    """x_nchw: (N,C,H,W); w*: (Cout,Cin,3,3); b*/gamma/beta: (C,).

    b1/b2 are accepted for interface parity but intentionally unused: a
    per-channel bias before training-mode BatchNorm is exactly cancelled by
    the mean subtraction (exact, not approximate).
    """
    del b1, b2
    N, C, H, W = x_nchw.shape
    Cp = _round_up(C, 128)

    # TODO(synk): in a full residual tower keep activations NHWC and
    # channel-padded across blocks so these HBM transposes/pads happen once
    # per network, not per block; weights should likewise be pre-converted
    # once outside the per-step path.
    x = jnp.transpose(x_nchw, (0, 2, 3, 1)).astype(jnp.float32)       # -> NHWC
    if Cp != C:
        x = jnp.pad(x, ((0, 0), (0, 0), (0, 0), (0, Cp - C)))
    x_pad = jnp.pad(x, ((0, 0), (1, 1), (1, 1), (0, 0))).astype(jnp.bfloat16)

    def prep_w(w):   # (Cout,Cin,3,3) -> (9, Cin, Cout), zero-padded, bf16
        wt = jnp.transpose(w, (2, 3, 1, 0)).reshape(9, C, C)
        wt = jnp.pad(wt, ((0, 0), (0, Cp - C), (0, Cp - C)))
        return wt.astype(jnp.bfloat16)

    w1p, w2p = prep_w(w1), prep_w(w2)
    gamma_p = jnp.pad(gamma.astype(jnp.float32), (0, Cp - C), constant_values=1.0)
    beta_p = jnp.pad(beta.astype(jnp.float32), (0, Cp - C))

    budget = max(_vmem_capacity_bytes(), 64 * 1024 * 1024)
    nb = block_n if block_n is not None else _pick_block_n(N, H, W, Cp, budget)
    assert N % nb == 0, f"block_n={nb} must divide N={N}"
    G = N // nb
    vmem_limit = int(min(0.9 * budget,
                         max(32 * 1024 * 1024,
                             2 * _estimate_block_bytes(nb, H, W, Cp))))
    cparams = pltpu.CompilerParams(dimension_semantics=("parallel",),
                                   vmem_limit_bytes=vmem_limit)

    conv_flops = 2 * N * H * W * 9 * Cp * Cp
    act_bytes = 4 * N * H * W * Cp

    def blk4(shape):
        return pl.BlockSpec(shape, lambda i: (i, 0, 0, 0))

    w_spec = pl.BlockSpec((9, Cp, Cp), lambda i: (0, 0, 0))
    a_spec = pl.BlockSpec((2, Cp), lambda i: (0, 0))
    st_spec = pl.BlockSpec((1, 2, Cp), lambda i: (i, 0, 0))

    # Pass 1: conv1 + BN1 partial statistics.
    y1, st1 = pl.pallas_call(
        _conv1_kernel,
        grid=(G,),
        in_specs=[blk4((nb, H + 2, W + 2, Cp)), w_spec],
        out_specs=(blk4((nb, H, W, Cp)), st_spec),
        out_shape=(jax.ShapeDtypeStruct((N, H, W, Cp), jnp.float32),
                   jax.ShapeDtypeStruct((G, 2, Cp), jnp.float32)),
        compiler_params=cparams,
        cost_estimate=pl.CostEstimate(flops=conv_flops, transcendentals=0,
                                      bytes_accessed=2 * act_bytes),
    )(x_pad, w1p)

    sc1 = _finalize_bn(st1, gamma_p, beta_p, N * H * W)

    # Pass 2: apply BN1 + ReLU, conv2 + BN2 partial statistics.
    y2, st2 = pl.pallas_call(
        _conv2_kernel,
        grid=(G,),
        in_specs=[blk4((nb, H, W, Cp)), w_spec, a_spec],
        out_specs=(blk4((nb, H, W, Cp)), st_spec),
        out_shape=(jax.ShapeDtypeStruct((N, H, W, Cp), jnp.float32),
                   jax.ShapeDtypeStruct((G, 2, Cp), jnp.float32)),
        scratch_shapes=[pltpu.VMEM((nb, H + 2, W + 2, Cp), jnp.bfloat16)],
        compiler_params=cparams,
        cost_estimate=pl.CostEstimate(flops=conv_flops, transcendentals=0,
                                      bytes_accessed=2 * act_bytes),
    )(y1, w2p, sc1)

    sc2 = _finalize_bn(st2, gamma_p, beta_p, N * H * W)

    # Pass 3: apply BN2 + residual + ReLU (lane-dense elementwise).
    out = pl.pallas_call(
        _finalize_kernel,
        grid=(G,),
        in_specs=[blk4((nb, H, W, Cp)), blk4((nb, H, W, Cp)), a_spec],
        out_specs=blk4((nb, H, W, Cp)),
        out_shape=jax.ShapeDtypeStruct((N, H, W, Cp), jnp.float32),
        compiler_params=cparams,
        cost_estimate=pl.CostEstimate(flops=4 * N * H * W * Cp, transcendentals=0,
                                      bytes_accessed=3 * act_bytes),
    )(y2, x, sc2)

    out = out[..., :C]
    return jnp.transpose(out, (0, 3, 1, 2))                           # back to NCHW


# ----------------------------------------------------------------------------
# Pure-JAX reference (NCHW, f32; keeps the conv biases, which cancel under BN)
# ----------------------------------------------------------------------------
def residual_block_ref(x, w1, b1, w2, b2, gamma, beta, eps=_EPS):
    def conv(h, w, b):
        y = jax.lax.conv_general_dilated(
            h, w, window_strides=(1, 1), padding="SAME",
            dimension_numbers=("NCHW", "OIHW", "NCHW"))
        return y + b[None, :, None, None]

    def bn(y):
        mean = jnp.mean(y, axis=(0, 2, 3), keepdims=True)
        var = jnp.mean((y - mean) ** 2, axis=(0, 2, 3), keepdims=True)
        return ((y - mean) * jax.lax.rsqrt(var + eps)
                * gamma[None, :, None, None] + beta[None, :, None, None])

    h = jax.nn.relu(bn(conv(x, w1, b1)))
    h = bn(conv(h, w2, b2))
    return jax.nn.relu(h + x)


if __name__ == "__main__":
    # small shapes: batch=2, planes=in_planes=32, spatial=8x8
    N, C, H, W = 2, 32, 8, 8
    key = jax.random.PRNGKey(0)
    k1, k2, k3, k4, k5, k6, k7 = jax.random.split(key, 7)

    x = jax.random.normal(k1, (N, C, H, W), jnp.float32)
    w1 = 0.1 * jax.random.normal(k2, (C, C, 3, 3), jnp.float32)   # conv1.weight
    b1 = 0.1 * jax.random.normal(k3, (C,), jnp.float32)           # conv1.bias
    w2 = 0.1 * jax.random.normal(k4, (C, C, 3, 3), jnp.float32)   # conv2.weight
    b2 = 0.1 * jax.random.normal(k5, (C,), jnp.float32)           # conv2.bias
    gamma = 1.0 + 0.1 * jax.random.normal(k6, (C,), jnp.float32)  # batch_norm.weight
    beta = 0.1 * jax.random.normal(k7, (C,), jnp.float32)         # batch_norm.bias

    # block_n=1 -> grid of 2 batch blocks, exercising the pipelined grid path.
    out = jax.block_until_ready(
        residual_block(x, w1, b1, w2, b2, gamma, beta, block_n=1))
    ref = residual_block_ref(x, w1, b1, w2, b2, gamma, beta)

    assert out.shape == x.shape and out.dtype == jnp.float32
    max_err = float(jnp.max(jnp.abs(out - ref)))
    # bf16 MXU operands vs. an all-f32 reference; tolerance sized for bf16
    # rounding, still far below any real-bug error (wrong tap alignment or BN
    # stats would give O(1) discrepancies).
    assert max_err < 5e-2, f"max_err={max_err}"
    print("KERNEL_OK")
</pallas_src>

<mosaic_0001>
module attributes {stable_mosaic.version = 11 : i64} {
  func.func @_conv1_kernel(%arg0: i32, %arg1: memref<1x10x10x128xbf16, #tpu.memory_space<vmem>>, %arg2: memref<9x128x128xbf16, #tpu.memory_space<vmem>>, %arg3: memref<1x8x8x128xf32, #tpu.memory_space<vmem>>, %arg4: memref<1x2x128xf32, #tpu.memory_space<vmem>>) attributes {dimension_semantics = [#tpu.dimension_semantics<parallel>], iteration_bounds = array<i64: 2>, scalar_prefetch = 0 : i64, scratch_operands = 0 : i64, tpu.core_type = #tpu.core_type<tc>, window_params = [{transform_indices = @transform_0, window_bounds = array<i64: 1, 10, 10, 128>}, {pipeline_mode = #tpu.pipeline_mode<synchronous>, transform_indices = @transform_1, window_bounds = array<i64: 9, 128, 128>}, {transform_indices = @transform_2, window_bounds = array<i64: 1, 8, 8, 128>}, {transform_indices = @transform_3, window_bounds = array<i64: 1, 2, 128>}]} {
    %c0 = arith.constant 0 : index
    %c0_0 = arith.constant 0 : index
    %c0_1 = arith.constant 0 : index
    %c0_2 = arith.constant 0 : index
    %0 = vector.load %arg1[%c0, %c0_0, %c0_1, %c0_2] : memref<1x10x10x128xbf16, #tpu.memory_space<vmem>>, vector<1x8x8x128xbf16>
    %1 = vector.shape_cast %0 : vector<1x8x8x128xbf16> to vector<64x128xbf16>
    %c0_3 = arith.constant 0 : index
    %c0_4 = arith.constant 0 : index
    %c0_5 = arith.constant 0 : index
    %2 = vector.load %arg2[%c0_3, %c0_4, %c0_5] : memref<9x128x128xbf16, #tpu.memory_space<vmem>>, vector<1x128x128xbf16>
    %3 = vector.shape_cast %2 : vector<1x128x128xbf16> to vector<128x128xbf16>
    %cst = arith.constant dense<0.000000e+00> : vector<64x128xf32>
    %4 = tpu.matmul %1, %3, %cst {dimension_numbers = #tpu.dot_dimension_numbers<[1], [0], [0], [1], [0, 0, 1, 1], [], []>} : vector<64x128xbf16>, vector<128x128xbf16>, vector<64x128xf32> -> vector<64x128xf32>
    %c0_6 = arith.constant 0 : index
    %c0_7 = arith.constant 0 : index
    %c1 = arith.constant 1 : index
    %c0_8 = arith.constant 0 : index
    %5 = vector.load %arg1[%c0_6, %c0_7, %c1, %c0_8] : memref<1x10x10x128xbf16, #tpu.memory_space<vmem>>, vector<1x8x8x128xbf16>
    %6 = vector.shape_cast %5 : vector<1x8x8x128xbf16> to vector<64x128xbf16>
    %c1_9 = arith.constant 1 : index
    %c0_10 = arith.constant 0 : index
    %c0_11 = arith.constant 0 : index
    %7 = vector.load %arg2[%c1_9, %c0_10, %c0_11] : memref<9x128x128xbf16, #tpu.memory_space<vmem>>, vector<1x128x128xbf16>
    %8 = vector.shape_cast %7 : vector<1x128x128xbf16> to vector<128x128xbf16>
    %cst_12 = arith.constant dense<0.000000e+00> : vector<64x128xf32>
    %9 = tpu.matmul %6, %8, %cst_12 {dimension_numbers = #tpu.dot_dimension_numbers<[1], [0], [0], [1], [0, 0, 1, 1], [], []>} : vector<64x128xbf16>, vector<128x128xbf16>, vector<64x128xf32> -> vector<64x128xf32>
    %10 = arith.addf %4, %9 : vector<64x128xf32>
    %c0_13 = arith.constant 0 : index
    %c0_14 = arith.constant 0 : index
    %c2 = arith.constant 2 : index
    %c0_15 = arith.constant 0 : index
    %11 = vector.load %arg1[%c0_13, %c0_14, %c2, %c0_15] : memref<1x10x10x128xbf16, #tpu.memory_space<vmem>>, vector<1x8x8x128xbf16>
    %12 = vector.shape_cast %11 : vector<1x8x8x128xbf16> to vector<64x128xbf16>
    %c2_16 = arith.constant 2 : index
    %c0_17 = arith.constant 0 : index
    %c0_18 = arith.constant 0 : index
    %13 = vector.load %arg2[%c2_16, %c0_17, %c0_18] : memref<9x128x128xbf16, #tpu.memory_space<vmem>>, vector<1x128x128xbf16>
    %14 = vector.shape_cast %13 : vector<1x128x128xbf16> to vector<128x128xbf16>
    %cst_19 = arith.constant dense<0.000000e+00> : vector<64x128xf32>
    %15 = tpu.matmul %12, %14, %cst_19 {dimension_numbers = #tpu.dot_dimension_numbers<[1], [0], [0], [1], [0, 0, 1, 1], [], []>} : vector<64x128xbf16>, vector<128x128xbf16>, vector<64x128xf32> -> vector<64x128xf32>
    %16 = arith.addf %10, %15 : vector<64x128xf32>
    %c0_20 = arith.constant 0 : index
    %c1_21 = arith.constant 1 : index
    %c0_22 = arith.constant 0 : index
    %c0_23 = arith.constant 0 : index
    %17 = vector.load %arg1[%c0_20, %c1_21, %c0_22, %c0_23] : memref<1x10x10x128xbf16, #tpu.memory_space<vmem>>, vector<1x8x8x128xbf16>
    %18 = vector.shape_cast %17 : vector<1x8x8x128xbf16> to vector<64x128xbf16>
    %c3 = arith.constant 3 : index
    %c0_24 = arith.constant 0 : index
    %c0_25 = arith.constant 0 : index
    %19 = vector.load %arg2[%c3, %c0_24, %c0_25] : memref<9x128x128xbf16, #tpu.memory_space<vmem>>, vector<1x128x128xbf16>
    %20 = vector.shape_cast %19 : vector<1x128x128xbf16> to vector<128x128xbf16>
    %cst_26 = arith.constant dense<0.000000e+00> : vector<64x128xf32>
    %21 = tpu.matmul %18, %20, %cst_26 {dimension_numbers = #tpu.dot_dimension_numbers<[1], [0], [0], [1], [0, 0, 1, 1], [], []>} : vector<64x128xbf16>, vector<128x128xbf16>, vector<64x128xf32> -> vector<64x128xf32>
    %22 = arith.addf %16, %21 : vector<64x128xf32>
    %c0_27 = arith.constant 0 : index
    %c1_28 = arith.constant 1 : index
    %c1_29 = arith.constant 1 : index
    %c0_30 = arith.constant 0 : index
    %23 = vector.load %arg1[%c0_27, %c1_28, %c1_29, %c0_30] : memref<1x10x10x128xbf16, #tpu.memory_space<vmem>>, vector<1x8x8x128xbf16>
    %24 = vector.shape_cast %23 : vector<1x8x8x128xbf16> to vector<64x128xbf16>
    %c4 = arith.constant 4 : index
    %c0_31 = arith.constant 0 : index
    %c0_32 = arith.constant 0 : index
    %25 = vector.load %arg2[%c4, %c0_31, %c0_32] : memref<9x128x128xbf16, #tpu.memory_space<vmem>>, vector<1x128x128xbf16>
    %26 = vector.shape_cast %25 : vector<1x128x128xbf16> to vector<128x128xbf16>
    %cst_33 = arith.constant dense<0.000000e+00> : vector<64x128xf32>
    %27 = tpu.matmul %24, %26, %cst_33 {dimension_numbers = #tpu.dot_dimension_numbers<[1], [0], [0], [1], [0, 0, 1, 1], [], []>} : vector<64x128xbf16>, vector<128x128xbf16>, vector<64x128xf32> -> vector<64x128xf32>
    %28 = arith.addf %22, %27 : vector<64x128xf32>
    %c0_34 = arith.constant 0 : index
    %c1_35 = arith.constant 1 : index
    %c2_36 = arith.constant 2 : index
    %c0_37 = arith.constant 0 : index
    %29 = vector.load %arg1[%c0_34, %c1_35, %c2_36, %c0_37] : memref<1x10x10x128xbf16, #tpu.memory_space<vmem>>, vector<1x8x8x128xbf16>
    %30 = vector.shape_cast %29 : vector<1x8x8x128xbf16> to vector<64x128xbf16>
    %c5 = arith.constant 5 : index
    %c0_38 = arith.constant 0 : index
    %c0_39 = arith.constant 0 : index
    %31 = vector.load %arg2[%c5, %c0_38, %c0_39] : memref<9x128x128xbf16, #tpu.memory_space<vmem>>, vector<1x128x128xbf16>
    %32 = vector.shape_cast %31 : vector<1x128x128xbf16> to vector<128x128xbf16>
    %cst_40 = arith.constant dense<0.000000e+00> : vector<64x128xf32>
    %33 = tpu.matmul %30, %32, %cst_40 {dimension_numbers = #tpu.dot_dimension_numbers<[1], [0], [0], [1], [0, 0, 1, 1], [], []>} : vector<64x128xbf16>, vector<128x128xbf16>, vector<64x128xf32> -> vector<64x128xf32>
    %34 = arith.addf %28, %33 : vector<64x128xf32>
    %c0_41 = arith.constant 0 : index
    %c2_42 = arith.constant 2 : index
    %c0_43 = arith.constant 0 : index
    %c0_44 = arith.constant 0 : index
    %35 = vector.load %arg1[%c0_41, %c2_42, %c0_43, %c0_44] : memref<1x10x10x128xbf16, #tpu.memory_space<vmem>>, vector<1x8x8x128xbf16>
    %36 = vector.shape_cast %35 : vector<1x8x8x128xbf16> to vector<64x128xbf16>
    %c6 = arith.constant 6 : index
    %c0_45 = arith.constant 0 : index
    %c0_46 = arith.constant 0 : index
    %37 = vector.load %arg2[%c6, %c0_45, %c0_46] : memref<9x128x128xbf16, #tpu.memory_space<vmem>>, vector<1x128x128xbf16>
    %38 = vector.shape_cast %37 : vector<1x128x128xbf16> to vector<128x128xbf16>
    %cst_47 = arith.constant dense<0.000000e+00> : vector<64x128xf32>
    %39 = tpu.matmul %36, %38, %cst_47 {dimension_numbers = #tpu.dot_dimension_numbers<[1], [0], [0], [1], [0, 0, 1, 1], [], []>} : vector<64x128xbf16>, vector<128x128xbf16>, vector<64x128xf32> -> vector<64x128xf32>
    %40 = arith.addf %34, %39 : vector<64x128xf32>
    %c0_48 = arith.constant 0 : index
    %c2_49 = arith.constant 2 : index
    %c1_50 = arith.constant 1 : index
    %c0_51 = arith.constant 0 : index
    %41 = vector.load %arg1[%c0_48, %c2_49, %c1_50, %c0_51] : memref<1x10x10x128xbf16, #tpu.memory_space<vmem>>, vector<1x8x8x128xbf16>
    %42 = vector.shape_cast %41 : vector<1x8x8x128xbf16> to vector<64x128xbf16>
    %c7 = arith.constant 7 : index
    %c0_52 = arith.constant 0 : index
    %c0_53 = arith.constant 0 : index
    %43 = vector.load %arg2[%c7, %c0_52, %c0_53] : memref<9x128x128xbf16, #tpu.memory_space<vmem>>, vector<1x128x128xbf16>
    %44 = vector.shape_cast %43 : vector<1x128x128xbf16> to vector<128x128xbf16>
    %cst_54 = arith.constant dense<0.000000e+00> : vector<64x128xf32>
    %45 = tpu.matmul %42, %44, %cst_54 {dimension_numbers = #tpu.dot_dimension_numbers<[1], [0], [0], [1], [0, 0, 1, 1], [], []>} : vector<64x128xbf16>, vector<128x128xbf16>, vector<64x128xf32> -> vector<64x128xf32>
    %46 = arith.addf %40, %45 : vector<64x128xf32>
    %c0_55 = arith.constant 0 : index
    %c2_56 = arith.constant 2 : index
    %c2_57 = arith.constant 2 : index
    %c0_58 = arith.constant 0 : index
    %47 = vector.load %arg1[%c0_55, %c2_56, %c2_57, %c0_58] : memref<1x10x10x128xbf16, #tpu.memory_space<vmem>>, vector<1x8x8x128xbf16>
    %48 = vector.shape_cast %47 : vector<1x8x8x128xbf16> to vector<64x128xbf16>
    %c8 = arith.constant 8 : index
    %c0_59 = arith.constant 0 : index
    %c0_60 = arith.constant 0 : index
    %49 = vector.load %arg2[%c8, %c0_59, %c0_60] : memref<9x128x128xbf16, #tpu.memory_space<vmem>>, vector<1x128x128xbf16>
    %50 = vector.shape_cast %49 : vector<1x128x128xbf16> to vector<128x128xbf16>
    %cst_61 = arith.constant dense<0.000000e+00> : vector<64x128xf32>
    %51 = tpu.matmul %48, %50, %cst_61 {dimension_numbers = #tpu.dot_dimension_numbers<[1], [0], [0], [1], [0, 0, 1, 1], [], []>} : vector<64x128xbf16>, vector<128x128xbf16>, vector<64x128xf32> -> vector<64x128xf32>
    %52 = arith.addf %46, %51 : vector<64x128xf32>
    %cst_62 = arith.constant dense<0.000000e+00> : vector<128xf32>
    %53 = vector.multi_reduction <add>, %52, %cst_62 [0] : vector<64x128xf32> to vector<128xf32>
    %54 = vector.shape_cast %53 : vector<128xf32> to vector<1x128xf32>
    %c0_63 = arith.constant 0 : index
    %c0_64 = arith.constant 0 : index
    %c0_65 = arith.constant 0 : index
    %55 = vector.load %arg4[%c0_63, %c0_64, %c0_65] : memref<1x2x128xf32, #tpu.memory_space<vmem>>, vector<1x1x128xf32>
    %56 = vector.shape_cast %55 : vector<1x1x128xf32> to vector<1x128xf32>
    %57 = vector.shape_cast %54 : vector<1x128xf32> to vector<1x1x128xf32>
    tpu.vector_store %arg4[%c0_63, %c0_64, %c0_65], %57 {strides = array<i32>} : memref<1x2x128xf32, #tpu.memory_space<vmem>>, vector<1x1x128xf32>,
    %58 = arith.mulf %52, %52 : vector<64x128xf32>
    %cst_66 = arith.constant dense<0.000000e+00> : vector<128xf32>
    %59 = vector.multi_reduction <add>, %58, %cst_66 [0] : vector<64x128xf32> to vector<128xf32>
    %60 = vector.shape_cast %59 : vector<128xf32> to vector<1x128xf32>
    %c0_67 = arith.constant 0 : index
    %c1_68 = arith.constant 1 : index
    %c0_69 = arith.constant 0 : index
    %61 = vector.load %arg4[%c0_67, %c1_68, %c0_69] : memref<1x2x128xf32, #tpu.memory_space<vmem>>, vector<1x1x128xf32>
    %62 = vector.shape_cast %61 : vector<1x1x128xf32> to vector<1x128xf32>
    %63 = vector.shape_cast %60 : vector<1x128xf32> to vector<1x1x128xf32>
    tpu.vector_store %arg4[%c0_67, %c1_68, %c0_69], %63 {strides = array<i32>} : memref<1x2x128xf32, #tpu.memory_space<vmem>>, vector<1x1x128xf32>,
    %64 = vector.shape_cast %52 : vector<64x128xf32> to vector<1x8x8x128xf32>
    %c0_70 = arith.constant 0 : index
    %c0_71 = arith.constant 0 : index
    %c0_72 = arith.constant 0 : index
    %c0_73 = arith.constant 0 : index
    %65 = vector.load %arg3[%c0_70, %c0_71, %c0_72, %c0_73] : memref<1x8x8x128xf32, #tpu.memory_space<vmem>>, vector<1x8x8x128xf32>
    tpu.vector_store %arg3[%c0_70, %c0_71, %c0_72, %c0_73], %64 {strides = array<i32>} : memref<1x8x8x128xf32, #tpu.memory_space<vmem>>, vector<1x8x8x128xf32>,
    return
  }
  func.func @transform_0(%arg0: i32) -> (i32, i32, i32, i32) {
    %c0_i32 = arith.constant 0 : i32
    %c0_i32_0 = arith.constant 0 : i32
    %c0_i32_1 = arith.constant 0 : i32
    %c0_i32_2 = arith.constant 0 : i32
    return %arg0, %c0_i32, %c0_i32_0, %c0_i32_1 : i32, i32, i32, i32
  }
  func.func @transform_1(%arg0: i32) -> (i32, i32, i32) {
    %c0_i32 = arith.constant 0 : i32
    %c0_i32_0 = arith.constant 0 : i32
    %c0_i32_1 = arith.constant 0 : i32
    %c0_i32_2 = arith.constant 0 : i32
    return %c0_i32, %c0_i32_0, %c0_i32_1 : i32, i32, i32
  }
  func.func @transform_2(%arg0: i32) -> (i32, i32, i32, i32) {
    %c0_i32 = arith.constant 0 : i32
    %c0_i32_0 = arith.constant 0 : i32
    %c0_i32_1 = arith.constant 0 : i32
    %c0_i32_2 = arith.constant 0 : i32
    return %arg0, %c0_i32, %c0_i32_0, %c0_i32_1 : i32, i32, i32, i32
  }
  func.func @transform_3(%arg0: i32) -> (i32, i32, i32) {
    %c0_i32 = arith.constant 0 : i32
    %c0_i32_0 = arith.constant 0 : i32
    %c0_i32_1 = arith.constant 0 : i32
    return %arg0, %c0_i32, %c0_i32_0 : i32, i32, i32
  }
}

</mosaic_0001>

<bundles_post_ra>
// kernel: tpu_custom_call.1
= control target key start
LH: loop header
LB: loop body
LE: loop exit
PB: predicated region body
PF: predicated region fallthrough
CT: control target
= control target key end

     0   :  { %9 = vsyncpa [#allocation3], 0  ;;  %s3787_s0 = inlined_call_operand.vmem [shape: bf16[2,10,10,128], index: 0, kind: input, shape index: {}]   ;;  %s3788_s1 = inlined_call_operand.hbm [shape: bf16[9,128,128], index: 1, kind: input, shape index: {}]   ;;  %s3789_s2 = inlined_call_operand.hbm [shape: f32[2,8,8,128], index: 2, kind: output, shape index: {0}]   ;;  %s3790_s3 = inlined_call_operand.hbm [shape: f32[2,2,128], index: 3, kind: output, shape index: {1}]  }
   0x1   :  { %10 = vsyncpa [#allocation4], 0 }
   0x2   :  { %12 = vsyncpa [#allocation4 + $0x1], 0 }
   0x3   :  { %13 = vsyncpa [#allocation7], 0 }
   0x4   :  { %15 = vsyncpa [#allocation7 + $0x1], 0  ;;  %s3263_s12 = smov 0   ;;  %s3265_s13 = smov 0  }
   0x5   :  { %s3267_s14 = smov 0   ;;  %s3269_s15 = smov 0  }
   0x6 LB: > { %s3284_s16 = sadd.s32 4294967295, %s3234_s15   ;;  %s2347_s17 = sadd.s32 4294967294, %s3234_s15   ;;  %s3234_s15 = sphi %s3269_s15, %s3810_s15   ;;  %s3230_s14 = sphi %s3267_s14, %s3809_s14   ;;  %s3226_s13 = sphi %s3265_s13, %s3808_s13   ;;  %s3222_s12 = sphi %s3263_s12, %s3807_s12  }
   0x7   : > { %s3288_s18 = sadd.s32 1, %s3234_s15   ;;  %s75_s19 = sadd.s32 1, %s3230_s14 }
   0x8   : > { %s72_s20 = ssub.s32 %s3234_s15, %s3288_s18  ;;  %p85_p0 = scmp.ne.s32.totalorder %s3230_s14, %s3226_s13 }
   0x9   : > { %p73_p1 = scmp.eq.s32.totalorder %s72_s20, 0  ;;  %p86_p2 = scmp.eq.s32.totalorder %s3284_s16, 1 }
   0xa   : > { %p91_p3 = scmp.ne.s32.totalorder %s3226_s13, %s3222_s12  ;;  %p92_p4 = scmp.eq.s32.totalorder %s2347_s17, 1 }
   0xb   : > { %s3299_s21 = scalar_select %p73_p1, %s3230_s14, %s75_s19  }
   0xc   : > { %p3301_p5 = por %p86_p2, %p85_p0  ;;  %p3305_p6 = por %p92_p4, %p91_p3 }
   0xd   : > { %p2348_p7 = scmp.ge.s32.totalorder %s3234_s15, 1  ;;  %p125_p8 = scmp.lt.s32.totalorder %s3234_s15, 3 }
   0xe   : > { %s3794_s22 = scalar_select %p3301_p5, 1, 0 }
   0xf   : > { %s3795_s23 = scalar_select %p3305_p6, 1, 0 }
  0x10   : > { %p3791_p9 = scmp.eq.s32.totalorder %s3284_s16, 0  ;;  %p3312_p10 = pnand %p2348_p7, %p125_p8 }
  0x11   : > { %s3236_s25 = smov [#allocation2]   ;;  %s3108_s30 = scalar_lea.hbm %s3788_s1, 9216 }
  0x12   : > { %s3796_s24 = scalar_select %p3312_p10, 1, 0 }
  0x13   : > { %s137_s26 = sshll.u32 %s3236_s25, 4  ;;  %p2973_p11 = pneg %p3312_p10  ;;  %s138_s26 = int_to_ptr.vmem [resolvable:$true] %s137_s26 }
  0x14   : > { %p3109_p13 = scmp.ne.s32.totalorder %s3788_s1, %s3108_s30  ;;  %p3115_p3 = scmp.lt.u32.totalorder %s3108_s30, %s3788_s1 }
  0x15   : > { %p3320_p12 = pnand %p3791_p9, %p2973_p11 }
  0x17   : > { %p3110_p0 = pneg %p3320_p12 }
  0x19   : > { %p3111_p1 = pnand %p3110_p0, %p3109_p13 }
  0x1b   : > { %p3112_p2 = pneg %p3111_p1 }
  0x1d   : > { %p3117_p4 = pnand %p3115_p3, %p3112_p2 }
  0x1f   : > { %3120 = shalt.err (!%p3117_p4)
}
  0x20   : > { %s3121_s8 = scalar_lea.vmem %s138_s26, 9216  ;;  %p3129_p9 = scmp.lt.s32.totalorder %s138_s26, %s138_s26 }
  0x21   : > { %p3122_p7 = scmp.ne.s32.totalorder %s138_s26, %s3121_s8  ;;  %p3130_p6 = scmp.lt.s32.totalorder %s3121_s8, %s3121_s8 }
  0x23   : > { %p3124_p8 = pnand %p3122_p7, %p3110_p0  ;;  %p3131_p5 = por %p3130_p6, %p3129_p9 }
  0x25   : > { %p3125_p11 = pneg %p3124_p8 }
  0x27   : > { %p3132_p10 = pnand %p3131_p5, %p3125_p11 }
  0x29   : > { %3135 = shalt.err (!%p3132_p10)
}
  0x2a   : > { %s3237_s9 = smov 64   ;;  %s3238_s10 = smov 4  }
  0x2b   : > { %2976 = dma.hbm_to_vmem [thread:$0]  (!%p3320_p12), %s3788_s1, 9216, %s138_s26, [#allocation3], %s3237_s9, %s3237_s9, %s3238_s10  }
  0x2c   : > { %p3798_p13 = scmp.ne.s32.totalorder %s3796_s24, 0 }
  0x2d   : > { %p3799_p1 = scmp.eq.s32.totalorder (!%p3798_p13), %s3284_s16, 0 }
  0x2e   : > { %161 = sbr.rel (%p3798_p13) target bundleno = 488 (0x1e8), region = 28 }
  0x35   : > { %3209 = dma.done.wait (%p3799_p1), [#allocation3], 9216   ;;  %p3800_p0 = pmov %p3799_p1 }
  0x36   : > { %v3024_v0 = vld [vmem:[#allocation2 + $0x40] sm:$0xff]   ;;  %p190_p5 = scmp.lt.s32.totalorder %s3284_s16, 1  ;;  %v3026_v2 = vld [vmem:[#allocation2 + $0x48] sm:$0xff]   ;;  %v3028_v4 = vld [vmem:[#allocation2 + $0x50] sm:$0xff]   ;;  %vm228_vm0 = vsmask.f32 3328 }
  0x37   : > { %3211 = vsyncadd (%p3800_p0), [#allocation3], 4294958080  ;;  %v3025_v1 = vld [vmem:[#allocation2 + $0x100] sm:$0xff]   ;;  %2668 = vmatprep.subr.bf16.mxu1 %v3024_v0  ;;  %v3027_v3 = vld [vmem:[#allocation2 + $0x108] sm:$0xff]   ;;  %vm229_vm1 = vsmask.f32 7440 }
  0x38   : > { %2764 = vmatprep.subr.bf16.mxu0 %v3025_v1  ;;  %2669 = vmatpush3.bf16.msra.mxu1 %v3024_v0  ;;  %v3029_v5 = vld [vmem:[#allocation2 + $0x110] sm:$0xff]   ;;  %s191_s19 = scalar_select %p190_p5, %s3284_s16, 1  ;;  %v3030_v6 = vld [vmem:[#allocation2 + $0x58] sm:$0xff]   ;;  %v3032_v8 = vld [vmem:[#allocation2 + $0x60] sm:$0xff]   ;;  %vm650_vm3 = vcmask 1042432   ;;  %vm651_vm4 = vcmask 1046532  }
  0x39   : > { %2765 = vmatpush3.bf16.msra.mxu0 %v3025_v1  ;;  %2670 = vmatprep.subr.bf16.mxu1 %v3026_v2  ;;  %v3031_v7 = vld [vmem:[#allocation2 + $0x118] sm:$0xff]   ;;  %v3033_v9 = vld [vmem:[#allocation2 + $0x120] sm:$0xff]   ;;  %v3034_v10 = vld [vmem:[#allocation2 + $0x68] sm:$0xff]   ;;  %s3686_s27 = sand.u32 1, %s3226_s13   ;;  %s2559_s4 = sshll.u32 %s3284_s16, 10 }
  0x3a   : > { %2766 = vmatprep.subr.bf16.mxu0 %v3027_v3  ;;  %s2964_s20 = smul.u32 80, %s191_s19  ;;  %v3035_v11 = vld [vmem:[#allocation2 + $0x128] sm:$0xff]   ;;  %v3036_v22 = vld [vmem:[#allocation2 + $0x70] sm:$0xff]   ;;  %vm3381_vm2 = vmor %vm228_vm0, %vm229_vm1  ;;  %s2353_s28 = sshll.u32 %s3686_s27, 6 }
  0x3b   : > { %v3037_v26 = vld [vmem:[#allocation2 + $0x130] sm:$0xff]   ;;  %v3038_v44 = vld [vmem:[#allocation2 + $0x78] sm:$0xff]   ;;  %v3040_v61 = vld [vmem:[#allocation2] sm:$0xff]   ;;  %s182_s29 = scalar_lea.vmem [#allocation5], %s2353_s28  ;;  %s3704_s7 = scalar_lea.hbm %s3789_s2, %s2559_s4 }
  0x3c   : > { %2671 = vmatpush3.bf16.msra.mxu1 %v3026_v2  ;;  %s3351_s26 = scalar_lea.vmem %s3787_s0, %s2964_s20  ;;  %v3039_v49 = vld [vmem:[#allocation2 + $0x138] sm:$0xff]   ;;  %v3403_v63 = vld [vmem:[#allocation2 + $0x140] sm:$0xff]   ;;  %vm3507_vm5 = vmor %vm650_vm3, %vm651_vm4  ;;  %s2228_s30 = sshll.u32 %s182_s29, 4  ;;  %s3699_s30 = int_to_ptr.vmem [resolvable:$true] %s2228_s30 }
  0x3d   : > { %2767 = vmatpush3.bf16.msra.mxu0 %v3027_v3  ;;  %2672 = vmatprep.subr.bf16.mxu1 %v3028_v4  ;;  %v3354_v12 = vld [vmem:[%s3351_s26] sm:$0xf]  ;;  %v3357_v13 = vld [vmem:[%s3351_s26 + $0x8] sm:$0xf]  ;;  %v3360_v14 = vld [vmem:[%s3351_s26 + $0x4] sm:$0x1] }
  0x3e   : > { %2768 = vmatprep.subr.bf16.mxu0 %v3029_v5  ;;  %v3363_v15 = vld [vmem:[%s3351_s26 + $0xc] sm:$0x1]  ;;  %v232_v16 = vshrl.u32 %v3354_v12, 16  ;;  %v235_v17 = vshll.u32 %v3354_v12, 16  ;;  %v241_v18 = vshll.u32 %v3360_v14, 16  ;;  %v246_v19 = vshrl.u32 %v3357_v13, 16 }
  0x3f   : > { %v249_v20 = vshll.u32 %v3357_v13, 16  ;;  %v255_v21 = vshll.u32 %v3363_v15, 16  ;;  %v2420_v30 = vld [vmem:[%s3351_s26 + $0x8] sm:$0xf]  ;;  %v3373_v32 = vld [vmem:[%s3351_s26 + $0xc] sm:$0x1] }
  0x40   : > { %2673 = vmatpush3.bf16.msra.mxu1 %v3028_v4  ;;  %v234_v23 = vrot.slane %v232_v16, 4  ;;  %v237_v24 = vrot.slane %v235_v17, 5  ;;  %v248_v25 = vrot.slane %v246_v19, 4  ;;  %v243_v27 = vrot.slane %v241_v18, 5  ;;  %v2422_v33 = vld [vmem:[%s3351_s26 + $0x10] sm:$0xf] }
  0x41   : > { %2769 = vmatpush3.bf16.msra.mxu0 %v3029_v5  ;;  %2674 = vmatprep.subr.bf16.mxu1 %v3030_v6  ;;  %v251_v28 = vrot.slane %v249_v20, 5  ;;  %v257_v29 = vrot.slane %v255_v21, 5  ;;  %v3377_v34 = vld [vmem:[%s3351_s26 + $0x14] sm:$0x1]  ;;  %v1027_v37 = vshrl.u32 %v2420_v30, 16  ;;  %v1030_v38 = vshll.u32 %v2420_v30, 16 }
  0x42   : > { %2770 = vmatprep.subr.bf16.mxu0 %v3031_v7  ;;  %v238_v31 = vor.u32 %v237_v24, %v234_v23  ;;  %v1036_v39 = vshll.u32 %v3373_v32, 16  ;;  %v1041_v41 = vshrl.u32 %v2422_v33, 16  ;;  %v1044_v42 = vshll.u32 %v2422_v33, 16  ;;  %v3388_v48 = vld [vmem:[%s3351_s26 + $0x10] sm:$0xf]  ;;  %s2210_s8 = scalar_lea.sflag [#allocation4], %s3686_s27 }
  0x43   : > { %v252_v36 = vor.u32 %v251_v28, %v248_v25  ;;  %v1050_v43 = vshll.u32 %v3377_v34, 16  ;;  %v1029_v46 = vrot.slane %v1027_v37, 4  ;;  %v1032_v47 = vrot.slane %v1030_v38, 5  ;;  %v3393_v53 = vld [vmem:[%s3351_s26 + $0x18] sm:$0xf]  ;;  %s3136_s9 = scalar_lea.vmem %s3699_s30, 1024 }
  0x44   : > { %2675 = vmatpush3.bf16.msra.mxu1 %v3030_v6  ;;  %v239_v40 = vrot.slane %v238_v31, 4  ;;  %v1043_v51 = vrot.slane %v1041_v41, 4  ;;  %v1046_v52 = vrot.slane %v1044_v42, 5  ;;  %v1038_v56 = vrot.slane %v1036_v39, 5  ;;  %v3398_v58 = vld [vmem:[%s3351_s26 + $0x14] sm:$0x1]  ;;  %p3137_p6 = scmp.ne.s32.totalorder %s3699_s30, %s3136_s9 }
  0x45   : > { %2771 = vmatpush3.bf16.msra.mxu0 %v3031_v7  ;;  %2676 = vmatprep.subr.bf16.mxu1 %v3032_v8  ;;  %v253_v45 = vrot.slane %v252_v36, 4  ;;  %v1033_v55 = vor.u32 %v1032_v47, %v1029_v46  ;;  %v1052_v57 = vrot.slane %v1050_v43, 5  ;;  %v3401_v59 = vld [vmem:[%s3351_s26 + $0x1c] sm:$0x1]  ;;  %v260_v0 = vshrl.u32 %v3388_v48, 16  ;;  %p3805_p9 = scmp.ne.s32.totalorder %s3794_s22, 0 }
  0x46   : > { %2772 = vmatprep.subr.bf16.mxu0 %v3033_v9  ;;  %v244_v50 = vsel %vm3381_vm2, %v239_v40, %v243_v27  ;;  %v1047_v62 = vor.u32 %v1046_v52, %v1043_v51  ;;  %v263_v1 = vshll.u32 %v3388_v48, 16  ;;  %v2424_v2 = vld [vmem:[%s3351_s26 + $0x18] sm:$0xf]  ;;  %v269_v4 = vshll.u32 %v3398_v58, 16  ;;  %v3412_v7 = vld [vmem:[%s3351_s26 + $0x1c] sm:$0x1] }
  0x47   : > { %v258_v54 = vsel %vm3381_vm2, %v253_v45, %v257_v29  ;;  %v1034_v3 = vrot.slane %v1033_v55, 4  ;;  %v274_v5 = vshrl.u32 %v3393_v53, 16  ;;  %v277_v6 = vshll.u32 %v3393_v53, 16  ;;  %v2426_v16 = vld [vmem:[%s3351_s26 + $0x20] sm:$0xf]  ;;  %v3043_v55 = vld [vmem:[#allocation2 + $0x148] sm:$0xff]   ;;  %p3138_p10 = pnand %p3137_p6, %p3805_p9 }
  0x48   : > { %2677 = vmatpush3.bf16.msra.mxu1 %v3032_v8  ;;  %v2356_v60 = vcombine.low %v244_v50, %v258_v54  ;;  %v1048_v8 = vrot.slane %v1047_v62, 4  ;;  %v3419_v20 = vld [vmem:[%s3351_s26 + $0x24] sm:$0x1]  ;;  %v271_v23 = vrot.slane %v269_v4, 5  ;;  %v1055_v27 = vshrl.u32 %v2424_v2, 16  ;;  %s3239_s10 = smov [#allocation5]  }
  0x49   : > { %2773 = vmatpush3.bf16.msra.mxu0 %v3033_v9  ;;  %2678 = vmatprep.subr.bf16.mxu1 %v3034_v10  ;;  %v262_v9 = vrot.slane %v260_v0, 4  ;;  %v1039_v17 = vsel %vm3381_vm2, %v1034_v3, %v1038_v56  ;;  %v276_v18 = vrot.slane %v274_v5, 4  ;;  %v279_v19 = vrot.slane %v277_v6, 5  ;;  %v3044_v56 = vld [vmem:[#allocation2 + $0x10] sm:$0xff]   ;;  %v3437_v0 = vld [vmem:[%s3351_s26 + $0x20] sm:$0xf]  ;;  %p3139_p12 = pneg %p3138_p10 }
  0x4a   : > { %2774 = vmatprep.subr.bf16.mxu0 %v3035_v11  ;;  %2684 = vmatprep.mubr.bf16.mxu1 %v2356_v60  ;;  %v1053_v21 = vsel %vm3381_vm2, %v1048_v8, %v1052_v57  ;;  %v1058_v29 = vshll.u32 %v2424_v2, 16  ;;  %v1064_v30 = vshll.u32 %v3412_v7, 16  ;;  %v1069_v31 = vshrl.u32 %v2426_v16, 16  ;;  %v3446_v3 = vld [vmem:[%s3351_s26 + $0x2c] sm:$0x1]  ;;  %s3140_s11 = sshll.u32 %s3239_s10, 4  ;;  %s3141_s11 = int_to_ptr.vmem [resolvable:$false] %s3140_s11 }
  0x4b   : > { %v2436_v24 = vcombine.low %v1039_v17, %v1053_v21  ;;  %v280_v25 = vor.u32 %v279_v19, %v276_v18  ;;  %v1057_v36 = vrot.slane %v1055_v27, 4  ;;  %v1072_v37 = vshll.u32 %v2426_v16, 16  ;;  %v3046_v16 = vld [vmem:[#allocation2 + $0x18] sm:$0xff]   ;;  %v2430_v27 = vld [vmem:[%s3351_s26 + $0x30] sm:$0xf]  ;;  %s3142_s17 = scalar_lea.vmem %s3141_s11, 2048  ;;  %p3143_p2 = scmp.lt.s32.totalorder %s3699_s30, %s3141_s11 }
  0x4c   : > { %2679 = vmatpush3.bf16.msra.mxu1 %v3034_v10  ;;  %v265_v10 = vrot.slane %v263_v1, 5  ;;  %v1078_v38 = vshll.u32 %v3419_v20, 16  ;;  %v1060_v40 = vrot.slane %v1058_v29, 5  ;;  %v1071_v41 = vrot.slane %v1069_v31, 4  ;;  %v3440_v1 = vld [vmem:[%s3351_s26 + $0x28] sm:$0xf]  ;;  %p3144_p3 = scmp.lt.s32.totalorder %s3142_s17, %s3136_s9 }
  0x4d   : > { %2775 = vmatpush3.bf16.msra.mxu0 %v3035_v11  ;;  %2680 = vmatprep.subr.bf16.mxu1 %v3036_v22  ;;  %v283_v11 = vshll.u32 %v3401_v59, 16  ;;  %v281_v33 = vrot.slane %v280_v25, 4  ;;  %v1074_v43 = vrot.slane %v1072_v37, 5  ;;  %v1066_v47 = vrot.slane %v1064_v30, 5  ;;  %v3048_v29 = vld [vmem:[#allocation2 + $0x20] sm:$0xff]  }
  0x4e   : > { %2776 = vmatprep.subr.bf16.mxu0 %v3037_v26  ;;  %2780 = vmatprep.mubr.bf16.mxu0 %v2436_v24  ;;  %v1061_v46 = vor.u32 %v1060_v40, %v1057_v36  ;;  %v1318_v57 = vrot.slane %v3373_v32, 5  ;;  %v1322_v60 = vrot.slane %v3377_v34, 5  ;;  %v288_v4 = vshrl.u32 %v3437_v0, 16  ;;  %v2428_v24 = vld [vmem:[%s3351_s26 + $0x28] sm:$0xf]  ;;  %v3047_v36 = vld [vmem:[#allocation2 + $0x158] sm:$0xff]   ;;  %p3145_p4 = por %p3144_p3, %p3143_p2 }
  0x4f   : > { %v1075_v50 = vor.u32 %v1074_v43, %v1071_v41  ;;  %v291_v5 = vshll.u32 %v3437_v0, 16  ;;  %v302_v8 = vshrl.u32 %v3440_v1, 16  ;;  %v1083_v31 = vshrl.u32 %v2428_v24, 16 }
  0x50   : > { %2681 = vmatpush3.bf16.msra.mxu1 %v3036_v22  ;;  %v266_v22 = vor.u32 %v265_v10, %v262_v9  ;;  %v1062_v51 = vrot.slane %v1061_v46, 4  ;;  %v305_v9 = vshll.u32 %v3440_v1, 16  ;;  %v311_v10 = vshll.u32 %v3446_v3, 16  ;;  %v3050_v46 = vld [vmem:[#allocation2 + $0x28] sm:$0xff]   ;;  %p3146_p7 = pnand %p3145_p4, %p3139_p12 }
  0x51   : > { %2777 = vmatpush3.bf16.msra.mxu0 %v3037_v26  ;;  %2682 = vmatprep.subr.bf16.mxu1 %v3038_v44  ;;  %v285_v26 = vrot.slane %v283_v11, 5  ;;  %v1076_v52 = vrot.slane %v1075_v50, 4  ;;  %v3045_v11 = vld [vmem:[#allocation2 + $0x150] sm:$0xff]   ;;  %v290_v17 = vrot.slane %v288_v4, 4  ;;  %v293_v18 = vrot.slane %v291_v5, 5  ;;  %v3049_v5 = vld [vmem:[#allocation2 + $0x160] sm:$0xff]  }
  0x52   : > { %2778 = vmatprep.subr.bf16.mxu0 %v3039_v49  ;;  %v267_v28 = vrot.slane %v266_v22, 4  ;;  %v1067_v54 = vsel %vm3381_vm2, %v1062_v51, %v1066_v47  ;;  %v304_v21 = vrot.slane %v302_v8, 4  ;;  %v307_v22 = vrot.slane %v305_v9, 5 }
  0x53   : > { %v286_v42 = vsel %vm3381_vm2, %v281_v33, %v285_v26  ;;  %v294_v25 = vor.u32 %v293_v18, %v290_v17  ;;  %v3457_v26 = vld [vmem:[%s3351_s26 + $0x2c] sm:$0x1]  ;;  %v1086_v33 = vshll.u32 %v2428_v24, 16  ;;  %v3487_v17 = vld [vmem:[%s3351_s26 + $0x3c] sm:$0x1]  ;;  %v1330_v32 = vrot.slane %v3419_v20, 5 }
  0x54   : > { %2683 = vmatpush3.bf16.msra.mxu1 %v3038_v44  ;;  %v272_v39 = vsel %vm3381_vm2, %v267_v28, %v271_v23  ;;  %v3042_v44 = vld [vmem:[#allocation2 + $0x8] sm:$0xff]   ;;  %v313_v23 = vrot.slane %v311_v10, 5  ;;  %v3461_v28 = vld [vmem:[%s3351_s26 + $0x34] sm:$0x1]  ;;  %v308_v30 = vor.u32 %v307_v22, %v304_v21 }
  0x55   : > { %2779 = vmatpush3.bf16.msra.mxu0 %v3039_v49  ;;  %2692 = vmatprep.subr.bf16.mxu1 %v3040_v61  ;;  %v2357_v45 = vcombine.low %v272_v39, %v286_v42  ;;  %v1080_v49 = vrot.slane %v1078_v38, 5  ;;  %v295_v37 = vrot.slane %v294_v25, 4  ;;  %v1097_v38 = vshrl.u32 %v2430_v27, 16 }
  0x56   : > { %2788 = vmatprep.subr.bf16.mxu0 %v3403_v63  ;;  %v1100_v39 = vshll.u32 %v2430_v27, 16  ;;  %v1106_v40 = vshll.u32 %v3461_v28, 16  ;;  %v309_v41 = vrot.slane %v308_v30, 4  ;;  %v1085_v42 = vrot.slane %v1083_v31, 4  ;;  %v3493_v31 = vld [vmem:[%s3351_s26 + $0x44] sm:$0x1] }
  0x57   : > { %2685 = vmatmul.mubr.bf16.vlgmr.msra.gmra.mrb[0].mxu1 %v2357_v45  ;;  %v1081_v62 = vsel %vm3381_vm2, %v1076_v52, %v1080_v49  ;;  %v1088_v43 = vrot.slane %v1086_v33, 5  ;;  %v3466_v45 = vld [vmem:[%s3351_s26 + $0x30] sm:$0xf]  ;;  %v1099_v49 = vrot.slane %v1097_v38, 4  ;;  %v3471_v52 = vld [vmem:[%s3351_s26 + $0x38] sm:$0xf] }
  0x58   : > { %2693 = vmatpush3.bf16.msra.mxu1 %v3040_v61  ;;  %v2437_v2 = vcombine.low %v1067_v54, %v1081_v62  ;;  %v3443_v61 = vld [vmem:[%s3351_s26 + $0x24] sm:$0x1]  ;;  %v1102_v50 = vrot.slane %v1100_v39, 5  ;;  %v1108_v51 = vrot.slane %v1106_v40, 5  ;;  %v314_v54 = vsel %vm3381_vm2, %v309_v41, %v313_v23  ;;  %v3479_v62 = vld [vmem:[%s3351_s26 + $0x3c] sm:$0x1] }
  0x59   : > { %2694 = vmatprep.subr.bf16.mxu1 %v3042_v44  ;;  %v297_v6 = vshll.u32 %v3443_v61, 16  ;;  %v319_v4 = vshll.u32 %v3466_v45, 16  ;;  %v330_v10 = vshrl.u32 %v3471_v52, 16  ;;  %v333_v22 = vshll.u32 %v3471_v52, 16  ;;  %v2434_v23 = vld [vmem:[%s3351_s26 + $0x40] sm:$0xf] }
  0x5a   : > { %2781 = vmatmul.mubr.bf16.vlgmr.msra.gmra.mrb[0].mxu0 %v2437_v2  ;;  %v316_v2 = vshrl.u32 %v3466_v45, 16  ;;  %v1103_v8 = vor.u32 %v1102_v50, %v1099_v49  ;;  %v339_v30 = vshll.u32 %v3479_v62, 16  ;;  %v3051_v38 = vld [vmem:[#allocation2 + $0x168] sm:$0xff]   ;;  %v3052_v39 = vld [vmem:[#allocation2 + $0x30] sm:$0xff]  }
  0x5b   : > { %2789 = vmatpush3.bf16.msra.mxu0 %v3403_v63  ;;  %v299_v19 = vrot.slane %v297_v6, 5  ;;  %v1092_v63 = vshll.u32 %v3457_v26, 16  ;;  %v321_v21 = vrot.slane %v319_v4, 5  ;;  %v332_v27 = vrot.slane %v330_v10, 4 }
  0x5c   : > { %2695 = vmatpush3.bf16.msra.mxu1 %v3042_v44  ;;  %2790 = vmatprep.subr.bf16.mxu0 %v3043_v55  ;;  %v1104_v24 = vrot.slane %v1103_v8, 4  ;;  %v341_v41 = vrot.slane %v339_v30, 5  ;;  %v2448_v8 = vld [vmem:[%s3351_s26 + $0x8] sm:$0xe] }
  0x5d   : > { %2696 = vmatprep.subr.bf16.mxu1 %v3044_v56  ;;  %v1094_v44 = vrot.slane %v1092_v63, 5  ;;  %v300_v47 = vsel %vm3381_vm2, %v295_v37, %v299_v19  ;;  %v318_v19 = vrot.slane %v316_v2, 4  ;;  %v335_v63 = vrot.slane %v333_v22, 5 }
  0x5e   : > { %v2358_v6 = vcombine.low %v300_v47, %v314_v54  ;;  %v1109_v40 = vsel %vm3381_vm2, %v1104_v24, %v1108_v51  ;;  %v1128_v2 = vshll.u32 %v2434_v23, 16 }
  0x5f   : > { %2791 = vmatpush3.bf16.msra.mxu0 %v3043_v55  ;;  %v1089_v55 = vor.u32 %v1088_v43, %v1085_v42  ;;  %v1120_v43 = vshll.u32 %v3487_v17, 16  ;;  %v336_v49 = vor.u32 %v335_v63, %v332_v27 }
  0x60   : > { %2697 = vmatpush3.bf16.msra.mxu1 %v3044_v56  ;;  %2792 = vmatprep.subr.bf16.mxu0 %v3045_v11  ;;  %v3476_v56 = vld [vmem:[%s3351_s26 + $0x34] sm:$0x1] }
  0x61   : > { %2698 = vmatprep.subr.bf16.mxu1 %v3046_v16  ;;  %v325_v9 = vshll.u32 %v3476_v56, 16  ;;  %v1090_v18 = vrot.slane %v1089_v55, 4  ;;  %2688 = vmatprep.mubr.bf16.mxu1 %v2358_v6  ;;  %v1122_v54 = vrot.slane %v1120_v43, 5  ;;  %v1125_v55 = vshrl.u32 %v2434_v23, 16  ;;  %v3055_v43 = vld [vmem:[#allocation2 + $0x178] sm:$0xff]  }
  0x62   : > { %v337_v4 = vrot.slane %v336_v49, 4  ;;  %v1134_v6 = vshll.u32 %v3493_v31, 16  ;;  %v2368_v23 = vcombine.low %v3354_v12, %v3357_v13  ;;  %v3058_v49 = vld [vmem:[#allocation2 + $0x180] sm:$0xff]  }
  0x63   : > { %2793 = vmatpush3.bf16.msra.mxu0 %v3045_v11  ;;  %v327_v25 = vrot.slane %v325_v9, 5  ;;  %v1095_v33 = vsel %vm3381_vm2, %v1090_v18, %v1094_v44  ;;  %v322_v11 = vor.u32 %v321_v21, %v318_v19  ;;  %v1127_v10 = vrot.slane %v1125_v55, 4  ;;  %v3054_v18 = vld [vmem:[#allocation2 + $0x38] sm:$0xff]   ;;  %v3053_v21 = vld [vmem:[#allocation2 + $0x170] sm:$0xff]  }
  0x64   : > { %2699 = vmatpush3.bf16.msra.mxu1 %v3046_v16  ;;  %v2432_v16 = vld [vmem:[%s3351_s26 + $0x38] sm:$0xf]  ;;  %2794 = vmatprep.subr.bf16.mxu0 %v3047_v36  ;;  %v342_v22 = vsel %vm3381_vm2, %v337_v4, %v341_v41  ;;  %v2453_v55 = vld [vmem:[%s3351_s26 + $0x30] sm:$0xe] }
  0x65   : > { %2700 = vmatprep.subr.bf16.mxu1 %v3048_v29  ;;  %v1111_v37 = vshrl.u32 %v2432_v16, 16  ;;  %v1114_v42 = vshll.u32 %v2432_v16, 16  ;;  %v323_v47 = vrot.slane %v322_v11, 4  ;;  %v1130_v16 = vrot.slane %v1128_v2, 5  ;;  %v2450_v11 = vld [vmem:[%s3351_s26 + $0x18] sm:$0xe] }
  0x66   : > { %v2454_v4 = vld [vmem:[%s3351_s26 + $0x38] sm:$0xe] }
  0x67   : > { %2795 = vmatpush3.bf16.msra.mxu0 %v3047_v36  ;;  %v1113_v44 = vrot.slane %v1111_v37, 4  ;;  %v1116_v50 = vrot.slane %v1114_v42, 5  ;;  %v328_v51 = vsel %vm3381_vm2, %v323_v47, %v327_v25  ;;  %v2449_v36 = vld [vmem:[%s3351_s26 + $0x10] sm:$0xe]  ;;  %v1131_v30 = vor.u32 %v1130_v16, %v1127_v10  ;;  %v2451_v37 = vld [vmem:[%s3351_s26 + $0x20] sm:$0xe] }
  0x68   : > { %2701 = vmatpush3.bf16.msra.mxu1 %v3048_v29  ;;  %v2438_v29 = vcombine.low %v1095_v33, %v1109_v40  ;;  %2796 = vmatprep.subr.bf16.mxu0 %v3049_v5  ;;  %v2457_v24 = vrot.slane %v2449_v36, 9  ;;  %v2359_v25 = vcombine.low %v328_v51, %v342_v22  ;;  %v1136_v33 = vrot.slane %v1134_v6, 5  ;;  %v3057_v40 = vld [vmem:[#allocation2 + $0x80] sm:$0xff]   ;;  %v3060_v47 = vld [vmem:[#allocation2 + $0x88] sm:$0xff]   ;;  %v3064_v10 = vld [vmem:[#allocation2 + $0x98] sm:$0xff]  }
  0x69   : > { %2702 = vmatprep.subr.bf16.mxu1 %v3050_v46  ;;  %v1117_v9 = vor.u32 %v1116_v50, %v1113_v44  ;;  %v1132_v13 = vrot.slane %v1131_v30, 4  ;;  %v2459_v41 = vrot.slane %v2451_v37, 9  ;;  %v655_v44 = vrot.slane %v3360_v14, 5  ;;  %v2452_v50 = vld [vmem:[%s3351_s26 + $0x28] sm:$0xe] }
  0x6a   : > { %2784 = vmatprep.mubr.bf16.mxu0 %v2438_v29  ;;  %v1323_v63 = vsel %vm3507_vm5, %v2457_v24, %v1322_v60  ;;  %2689 = vmatmul.mubr.bf16.gmra.mrb[4].mxu1 %v2359_v25  ;;  %v2458_v60 = vrot.slane %v2450_v11, 9  ;;  %v2369_v29 = vcombine.low %v3388_v48, %v3393_v53  ;;  %v1334_v48 = vrot.slane %v3457_v26, 5  ;;  %v2455_v36 = vld [vmem:[%s3351_s26 + $0x40] sm:$0xe]  ;;  %v3065_v25 = vld [vmem:[#allocation2 + $0x198] sm:$0xff]  }
  0x6b   : > { %2797 = vmatpush3.bf16.msra.mxu0 %v3049_v5  ;;  %v1118_v27 = vrot.slane %v1117_v9, 4  ;;  %2708 = vmatprep.mubr.bf16.mxu1 %v2368_v23  ;;  %v1137_v34 = vsel %vm3381_vm2, %v1132_v13, %v1136_v33  ;;  %v2460_v2 = vrot.slane %v2452_v50, 9  ;;  %v1342_v51 = vrot.slane %v3487_v17, 5  ;;  %v3063_v17 = vld [vmem:[#allocation2 + $0x190] sm:$0xff]   ;;  %v3078_v50 = vld [vmem:[#allocation2 + $0x1c0] sm:$0xff]  }
  0x6c   : > { %2703 = vmatpush3.bf16.msra.mxu1 %v3050_v46  ;;  %v2456_v46 = vrot.slane %v2448_v8, 9  ;;  %2798 = vmatprep.subr.bf16.mxu0 %v3051_v38  ;;  %v2461_v14 = vrot.slane %v2453_v55, 9  ;;  %v1346_v26 = vrot.slane %v3493_v31, 5  ;;  %v659_v6 = vrot.slane %v3363_v15, 5  ;;  %v3077_v37 = vld [vmem:[%s3351_s26 + $0x10] ss:$8 sps:$4 sm:$0xff]  }
  0x6d   : > { %2704 = vmatprep.subr.bf16.mxu1 %v3052_v39  ;;  %v1123_v12 = vsel %vm3381_vm2, %v1118_v27, %v1122_v54  ;;  %v1338_v54 = vrot.slane %v3461_v28, 5  ;;  %v1335_v8 = vsel %vm3507_vm5, %v2460_v2, %v1334_v48  ;;  %v2371_v28 = vcombine.low %v3466_v45, %v3471_v52  ;;  %v3066_v27 = vld [vmem:[#allocation2 + $0xa0] sm:$0xff]   ;;  %v632_v48 = vld [vmem:[%s3351_s26 + $0x30] sm:$0xe] }
  0x6e   : > { %v1319_v5 = vsel %vm3507_vm5, %v2456_v46, %v1318_v57  ;;  %v2439_v42 = vcombine.low %v1123_v12, %v1137_v34  ;;  %v2462_v9 = vrot.slane %v2454_v4, 9  ;;  %v2463_v31 = vrot.slane %v2455_v36, 9  ;;  %v626_v46 = vld [vmem:[%s3351_s26] sm:$0xe]  ;;  %v3588_v4 = vld [vmem:[%s3351_s26 + $0x14] sm:$0x1] }
  0x6f   : > { %2799 = vmatpush3.bf16.msra.mxu0 %v3051_v38  ;;  %v2464_v57 = vcombine.low %v1319_v5, %v1323_v63  ;;  %v1331_v38 = vsel %vm3507_vm5, %v2459_v41, %v1330_v32  ;;  %v1339_v16 = vsel %vm3507_vm5, %v2461_v14, %v1338_v54  ;;  %v2380_v52 = vrot.slane %v626_v46, 9  ;;  %v628_v63 = vld [vmem:[%s3351_s26 + $0x10] sm:$0xe]  ;;  %v3067_v34 = vld [vmem:[#allocation2 + $0x1a0] sm:$0xff]  }
  0x70   : > { %2705 = vmatpush3.bf16.msra.mxu1 %v3052_v39  ;;  %v1326_v39 = vrot.slane %v3412_v7, 5  ;;  %2800 = vmatprep.subr.bf16.mxu0 %v3053_v21  ;;  %v2370_v7 = vcombine.low %v3437_v0, %v3440_v1  ;;  %v3061_v0 = vld [vmem:[#allocation2 + $0x188] sm:$0xff]   ;;  %v3062_v1 = vld [vmem:[#allocation2 + $0x90] sm:$0xff]   ;;  %v2466_v15 = vcombine.low %v1335_v8, %v1339_v16  ;;  %v1347_v45 = vsel %vm3507_vm5, %v2463_v31, %v1346_v26  ;;  %v2498_v26 = vld [vmem:[%s3351_s26 + $0x18] sm:$0xf] }
  0x71   : > { %2706 = vmatprep.subr.bf16.mxu1 %v3054_v18  ;;  %2785 = vmatmul.mubr.bf16.gmra.mrb[4].mxu0 %v2439_v42  ;;  %v663_v23 = vrot.slane %v3398_v58, 5  ;;  %v667_v24 = vrot.slane %v3401_v59, 5  ;;  %v656_v33 = vsel %vm3507_vm5, %v2380_v52, %v655_v44  ;;  %v629_v58 = vld [vmem:[%s3351_s26 + $0x18] sm:$0xe]  ;;  %v2382_v12 = vrot.slane %v628_v63, 9  ;;  %v3076_v44 = vld [vmem:[#allocation2 + $0xc0] sm:$0xff]  }
  0x72   : > { %2804 = vmatprep.mubr.bf16.mxu0 %v2464_v57  ;;  %v1327_v20 = vsel %vm3507_vm5, %v2458_v60, %v1326_v39  ;;  %v2383_v13 = vrot.slane %v629_v58, 9  ;;  %v3068_v39 = vld [vmem:[#allocation2 + $0xa8] sm:$0xff]   ;;  %v3071_v57 = vld [vmem:[#allocation2 + $0xb0] sm:$0xff]   ;;  %v671_v41 = vrot.slane %v3443_v61, 5  ;;  %v3074_v42 = vld [vmem:[#allocation2 + $0xb8] sm:$0xff]   ;;  %v2386_v55 = vrot.slane %v632_v48, 9 }
  0x73   : > { %2801 = vmatpush3.bf16.msra.mxu0 %v3053_v21  ;;  %v2465_v53 = vcombine.low %v1327_v20, %v1331_v38  ;;  %v627_v21 = vld [vmem:[%s3351_s26 + $0x8] sm:$0xe]  ;;  %v664_v59 = vsel %vm3507_vm5, %v2382_v12, %v663_v23  ;;  %v3072_v20 = vld [vmem:[#allocation2 + $0x1b0] sm:$0xff]   ;;  %v3616_v48 = vld [vmem:[%s3351_s26 + $0x2c] sm:$0x1] }
  0x74   : > { %2707 = vmatpush3.bf16.msra.mxu1 %v3054_v18  ;;  %2802 = vmatprep.subr.bf16.mxu0 %v3055_v43  ;;  %v1343_v18 = vsel %vm3507_vm5, %v2462_v9, %v1342_v51  ;;  %v2381_v22 = vrot.slane %v627_v21, 9  ;;  %v3069_v60 = vld [vmem:[#allocation2 + $0x1a8] sm:$0xff]   ;;  %v2496_v14 = vld [vmem:[%s3351_s26 + $0x10] sm:$0xf] }
  0x75   : > { %2716 = vmatprep.subr.bf16.mxu1 %v3057_v40  ;;  %v2467_v30 = vcombine.low %v1343_v18, %v1347_v45  ;;  %v3080_v51 = vld [vmem:[#allocation2 + $0xc8] sm:$0xff]   ;;  %v1693_v8 = vshll.u32 %v2496_v14, 16  ;;  %v3082_v31 = vld [vmem:[#allocation2 + $0xd0] sm:$0xff]  }
  0x76   : > { %v660_v11 = vsel %vm3507_vm5, %v2381_v22, %v659_v6  ;;  %v3592_v6 = vld [vmem:[%s3351_s26 + $0x1c] sm:$0x1]  ;;  %v3079_v36 = vld [vmem:[%s3351_s26 + $0x20] ss:$8 sps:$4 sm:$0xff]   ;;  %v3090_v45 = vld [vmem:[%s3351_s26 + $0x30] ss:$8 sps:$4 sm:$0xff]  }
  0x77   : > { %2709 = vmatmul.mubr.bf16.vlgmr.msra.gmra.mrb[0].mxu1 %v2369_v29  ;;  %2803 = vmatpush3.bf16.msra.mxu0 %v3055_v43  ;;  %v2388_v5 = vcombine.low %v656_v33, %v660_v11  ;;  %v675_v43 = vrot.slane %v3446_v3, 5  ;;  %v630_v29 = vld [vmem:[%s3351_s26 + $0x20] sm:$0xe]  ;;  %v1713_v16 = vshll.u32 %v3592_v6, 16  ;;  %v1695_v18 = vrot.slane %v1693_v8, 5  ;;  %v3081_v21 = vld [vmem:[#allocation2 + $0x1c8] sm:$0xff]  }
  0x78   : > { %2717 = vmatpush3.bf16.msra.mxu1 %v3057_v40  ;;  %2712 = vmatprep.mubr.bf16.mxu1 %v2370_v7  ;;  %v668_v40 = vsel %vm3507_vm5, %v2383_v13, %v667_v24  ;;  %v631_v7 = vld [vmem:[%s3351_s26 + $0x28] sm:$0xe]  ;;  %v2384_v38 = vrot.slane %v630_v29, 9  ;;  %v3084_v33 = vld [vmem:[#allocation2 + $0xd8] sm:$0xff]   ;;  %v3083_v63 = vld [vmem:[#allocation2 + $0x1d0] sm:$0xff]  }
  0x79   : > { %2718 = vmatprep.subr.bf16.mxu1 %v3060_v47  ;;  %2812 = vmatprep.subr.bf16.mxu0 %v3058_v49  ;;  %v2389_v32 = vcombine.low %v664_v59, %v668_v40  ;;  %v3092_v13 = vld [vmem:[%s3351_s26 + $0x40] ss:$8 sps:$4 sm:$0xff]   ;;  %v2504_v40 = vld [vmem:[%s3351_s26 + $0x30] sm:$0xf] }
  0x7a   : > { %2805 = vmatmul.mubr.bf16.vlgmr.msra.gmra.mrb[0].mxu0 %v2465_v53  ;;  %v672_v61 = vsel %vm3507_vm5, %v2384_v38, %v671_v41  ;;  %v633_v53 = vld [vmem:[%s3351_s26 + $0x38] sm:$0xe]  ;;  %v1746_v29 = vshrl.u32 %v2504_v40, 16 }
  0x7b   : > { %2813 = vmatpush3.bf16.msra.mxu0 %v3058_v49  ;;  %2808 = vmatprep.mubr.bf16.mxu0 %v2466_v15  ;;  %v3075_v49 = vld [vmem:[#allocation2 + $0x1b8] sm:$0xff]   ;;  %v2387_v2 = vrot.slane %v633_v53, 9 }
  0x7c   : > { %2719 = vmatpush3.bf16.msra.mxu1 %v3060_v47  ;;  %2814 = vmatprep.subr.bf16.mxu0 %v3061_v0  ;;  %v2385_v47 = vrot.slane %v631_v7, 9  ;;  %v1749_v7 = vshll.u32 %v2504_v40, 16  ;;  %v3095_v40 = vld [vmem:[#allocation2 + $0x1f8] sm:$0xff]  }
  0x7d   : > { %2720 = vmatprep.subr.bf16.mxu1 %v3062_v1 }
  0x7e   : > { %v676_v3 = vsel %vm3507_vm5, %v2385_v47, %v675_v43 }
  0x7f   : > { %2713 = vmatmul.mubr.bf16.gmra.mrb[4].mxu1 %v2371_v28  ;;  %2815 = vmatpush3.bf16.msra.mxu0 %v3061_v0  ;;  %v679_v0 = vrot.slane %v3476_v56, 5  ;;  %v2390_v54 = vcombine.low %v672_v61, %v676_v3  ;;  %v1690_v56 = vshrl.u32 %v2496_v14, 16  ;;  %v1704_v28 = vshrl.u32 %v2498_v26, 16 }
  0x80   : > { %2721 = vmatpush3.bf16.msra.mxu1 %v3062_v1  ;;  %2816 = vmatprep.subr.bf16.mxu0 %v3063_v17  ;;  %v683_v1 = vrot.slane %v3479_v62, 5  ;;  %v1699_v62 = vshll.u32 %v3588_v4, 16 }
  0x81   : > { %2722 = vmatprep.subr.bf16.mxu1 %v3064_v10  ;;  %2732 = vmatprep.mubr.bf16.mxu1 %v2388_v5  ;;  %v680_v9 = vsel %vm3507_vm5, %v2386_v55, %v679_v0  ;;  %v1692_v15 = vrot.slane %v1690_v56, 4  ;;  %v1706_v46 = vrot.slane %v1704_v28, 4  ;;  %v2500_v5 = vld [vmem:[%s3351_s26 + $0x20] sm:$0xf]  ;;  %v1748_v55 = vrot.slane %v1746_v29, 4 }
  0x82   : > { %2809 = vmatmul.mubr.bf16.gmra.mrb[4].mxu0 %v2467_v30  ;;  %v1701_v24 = vrot.slane %v1699_v62, 5  ;;  %v1715_v30 = vrot.slane %v1713_v16, 5  ;;  %v1721_v41 = vshll.u32 %v2500_v5, 16  ;;  %v2508_v56 = vld [vmem:[%s3351_s26 + $0x40] sm:$0xf]  ;;  %v1741_v62 = vshll.u32 %v3616_v48, 16 }
  0x83   : > { %2817 = vmatpush3.bf16.msra.mxu0 %v3063_v17  ;;  %2828 = vmatprep.mubr.bf16.mxu0 %v3077_v37  ;;  %v684_v17 = vsel %vm3507_vm5, %v2387_v2, %v683_v1  ;;  %v1696_v23 = vor.u32 %v1695_v18, %v1692_v15  ;;  %v2502_v37 = vld [vmem:[%s3351_s26 + $0x28] sm:$0xf]  ;;  %v3619_v1 = vld [vmem:[%s3351_s26 + $0x34] sm:$0x1]  ;;  %v1751_v2 = vrot.slane %v1749_v7, 5  ;;  %v1777_v15 = vshll.u32 %v2508_v56, 16 }
  0x84   : > { %2723 = vmatpush3.bf16.msra.mxu1 %v3064_v10  ;;  %2818 = vmatprep.subr.bf16.mxu0 %v3065_v25  ;;  %v1707_v10 = vshll.u32 %v2498_v26, 16  ;;  %v2391_v22 = vcombine.low %v680_v9, %v684_v17  ;;  %v1735_v43 = vshll.u32 %v2502_v37, 16  ;;  %v1723_v3 = vrot.slane %v1721_v41, 5  ;;  %v2510_v28 = vld [vmem:[%s3351_s26 + $0x48] sm:$0xf]  ;;  %v3093_v18 = vld [vmem:[#allocation2 + $0x1f0] sm:$0xff]  }
  0x85   : > { %2724 = vmatprep.subr.bf16.mxu1 %v3066_v27  ;;  %v1697_v11 = vrot.slane %v1696_v23, 4  ;;  %v1755_v17 = vshll.u32 %v3619_v1, 16  ;;  %v1752_v16 = vor.u32 %v1751_v2, %v1748_v55 }
  0x86   : > { %v1709_v52 = vrot.slane %v1707_v10, 5  ;;  %v1737_v0 = vrot.slane %v1735_v43, 5  ;;  %v3100_v43 = vld [vmem:[%s3351_s26 + $0x28] ss:$8 sps:$4 sm:$0xff]  }
  0x87   : > { %2819 = vmatpush3.bf16.msra.mxu0 %v3065_v25  ;;  %v3096_v25 = vld [vmem:[%s3351_s26 + $0x8] ss:$8 sps:$4 sm:$0xff]   ;;  %v1702_v12 = vsel %vm3381_vm2, %v1697_v11, %v1701_v24  ;;  %v3631_v11 = vld [vmem:[%s3351_s26 + $0x44] sm:$0x1] }
  0x88   : > { %2725 = vmatpush3.bf16.msra.mxu1 %v3066_v27  ;;  %2820 = vmatprep.subr.bf16.mxu0 %v3067_v34  ;;  %v1710_v27 = vor.u32 %v1709_v52, %v1706_v46  ;;  %v3094_v52 = vld [vmem:[#allocation2 + $0xf8] sm:$0xff]   ;;  %v1783_v41 = vshll.u32 %v3631_v11, 16 }
  0x89   : > { %2726 = vmatprep.subr.bf16.mxu1 %v3068_v39 }
  0x8a   : > { %v1711_v58 = vrot.slane %v1710_v27, 4  ;;  %v1753_v27 = vrot.slane %v1752_v16, 4  ;;  %v1785_v55 = vrot.slane %v1783_v41, 5 }
  0x8b   : > { %2821 = vmatpush3.bf16.msra.mxu0 %v3067_v34  ;;  %v2506_v34 = vld [vmem:[%s3351_s26 + $0x38] sm:$0xf] }
  0x8c   : > { %2727 = vmatpush3.bf16.msra.mxu1 %v3068_v39  ;;  %2822 = vmatprep.subr.bf16.mxu0 %v3069_v60  ;;  %v1716_v59 = vsel %vm3381_vm2, %v1711_v58, %v1715_v30  ;;  %v3086_v39 = vld [vmem:[#allocation2 + $0xe0] sm:$0xff]   ;;  %v1760_v38 = vshrl.u32 %v2506_v34, 16  ;;  %v1763_v47 = vshll.u32 %v2506_v34, 16  ;;  %v1757_v30 = vrot.slane %v1755_v17, 5  ;;  %v3634_v58 = vld [vmem:[%s3351_s26 + $0x4c] sm:$0x1] }
  0x8d   : > { %2728 = vmatprep.subr.bf16.mxu1 %v3071_v57  ;;  %v3097_v34 = vld [vmem:[%s3351_s26 + $0x18] ss:$8 sps:$4 sm:$0xff]   ;;  %v1985_v17 = vrot.slane %v3592_v6, 5 }
  0x8e   : > { %v1762_v14 = vrot.slane %v1760_v38, 4  ;;  %v1765_v26 = vrot.slane %v1763_v47, 5  ;;  %v1758_v29 = vsel %vm3381_vm2, %v1753_v27, %v1757_v30  ;;  %v3099_v47 = vld [vmem:[#allocation2 + $0x208] sm:$0xff]   ;;  %v3107_v30 = vld [vmem:[#allocation2 + $0x238] sm:$0xff]  }
  0x8f   : > { %2823 = vmatpush3.bf16.msra.mxu0 %v3069_v60  ;;  %v2512_v60 = vcombine.low %v1702_v12, %v1716_v59  ;;  %v3098_v59 = vld [vmem:[#allocation2 + $0x200] sm:$0xff]  }
  0x90   : > { %2729 = vmatpush3.bf16.msra.mxu1 %v3071_v57  ;;  %2824 = vmatprep.subr.bf16.mxu0 %v3072_v20  ;;  %v3085_v57 = vld [vmem:[#allocation2 + $0x1d8] sm:$0xff]   ;;  %v1766_v46 = vor.u32 %v1765_v26, %v1762_v14 }
  0x91   : > { %2730 = vmatprep.subr.bf16.mxu1 %v3074_v42  ;;  %v2525_v14 = vld [vmem:[%s3351_s26 + $0x18] sm:$0xe] }
  0x93   : > { %2825 = vmatpush3.bf16.msra.mxu0 %v3072_v20  ;;  %v3087_v20 = vld [vmem:[#allocation2 + $0x1e0] sm:$0xff]  }
  0x94   : > { %2731 = vmatpush3.bf16.msra.mxu1 %v3074_v42  ;;  %2826 = vmatprep.subr.bf16.mxu0 %v3075_v49  ;;  %v1732_v42 = vshrl.u32 %v2502_v37, 16  ;;  %v1779_v37 = vrot.slane %v1777_v15, 5  ;;  %v3103_v15 = vld [vmem:[#allocation2 + $0x218] sm:$0xff]  }
  0x95   : > { %2740 = vmatprep.subr.bf16.mxu1 %v3076_v44 }
  0x96   : > { %v1734_v53 = vrot.slane %v1732_v42, 4  ;;  %v1797_v42 = vshll.u32 %v3634_v58, 16 }
  0x97   : > { %2733 = vmatmul.mubr.bf16.vlgmr.msra.gmra.mrb[0].mxu1 %v2389_v32  ;;  %2827 = vmatpush3.bf16.msra.mxu0 %v3075_v49  ;;  %v1718_v32 = vshrl.u32 %v2500_v5, 16  ;;  %v3088_v49 = vld [vmem:[#allocation2 + $0xe8] sm:$0xff]  }
  0x98   : > { %2741 = vmatpush3.bf16.msra.mxu1 %v3076_v44  ;;  %2736 = vmatprep.mubr.bf16.mxu1 %v2390_v54  ;;  %v3613_v44 = vld [vmem:[%s3351_s26 + $0x24] sm:$0x1]  ;;  %v3622_v54 = vld [vmem:[%s3351_s26 + $0x3c] sm:$0x1]  ;;  %v1738_v9 = vor.u32 %v1737_v0, %v1734_v53  ;;  %v1799_v2 = vrot.slane %v1797_v42, 5 }
  0x99   : > { %2742 = vmatprep.subr.bf16.mxu1 %v3080_v51  ;;  %2836 = vmatprep.subr.bf16.mxu0 %v3078_v50  ;;  %v1720_v61 = vrot.slane %v1718_v32, 4  ;;  %v1727_v8 = vshll.u32 %v3613_v44, 16  ;;  %v1769_v10 = vshll.u32 %v3622_v54, 16  ;;  %v2529_v32 = vld [vmem:[%s3351_s26 + $0x38] sm:$0xe]  ;;  %v2001_v53 = vrot.slane %v3622_v54, 5 }
  0x9a   : > { %2829 = vmatmul.mubr.bf16.vlgmr.msra.gmra.mrb[0].mxu0 %v3079_v36  ;;  %v1739_v24 = vrot.slane %v1738_v9, 4  ;;  %v2533_v9 = vrot.slane %v2525_v14, 9 }
  0x9b   : > { %2837 = vmatpush3.bf16.msra.mxu0 %v3078_v50  ;;  %2832 = vmatprep.mubr.bf16.mxu0 %v3090_v45  ;;  %v3091_v50 = vld [vmem:[#allocation2 + $0xf0] sm:$0xff]   ;;  %v1724_v36 = vor.u32 %v1723_v3, %v1720_v61  ;;  %v1791_v45 = vshll.u32 %v2510_v28, 16  ;;  %v1729_v23 = vrot.slane %v1727_v8, 5  ;;  %v1997_v61 = vrot.slane %v3619_v1, 5 }
  0x9c   : > { %2743 = vmatpush3.bf16.msra.mxu1 %v3080_v51  ;;  %2838 = vmatprep.subr.bf16.mxu0 %v3081_v21  ;;  %v3089_v51 = vld [vmem:[#allocation2 + $0x1e8] sm:$0xff]   ;;  %v2537_v3 = vrot.slane %v2529_v32, 9  ;;  %v3102_v8 = vld [vmem:[#allocation2 + $0x210] sm:$0xff]   ;;  %v1986_v6 = vsel %vm3507_vm5, %v2533_v9, %v1985_v17 }
  0x9d   : > { %2744 = vmatprep.subr.bf16.mxu1 %v3082_v31 }
  0x9e   : > { %v2002_v54 = vsel %vm3507_vm5, %v2537_v3, %v2001_v53 }
  0x9f   : > { %2737 = vmatmul.mubr.bf16.gmra.mrb[4].mxu1 %v2391_v22  ;;  %2839 = vmatpush3.bf16.msra.mxu0 %v3081_v21  ;;  %v1788_v21 = vshrl.u32 %v2510_v28, 16  ;;  %v1725_v22 = vrot.slane %v1724_v36, 4  ;;  %v1981_v36 = vrot.slane %v3588_v4, 5 }
  0xa0   : > { %2745 = vmatpush3.bf16.msra.mxu1 %v3082_v31  ;;  %2756 = vmatprep.mubr.bf16.mxu1 %v3096_v25  ;;  %v1774_v31 = vshrl.u32 %v2508_v56, 16  ;;  %v1743_v25 = vrot.slane %v1741_v62, 5  ;;  %v3101_v62 = vld [vmem:[%s3351_s26 + $0x38] ss:$8 sps:$4 sm:$0xff]  }
  0xa1   : > { %2746 = vmatprep.subr.bf16.mxu1 %v3084_v33  ;;  %2840 = vmatprep.subr.bf16.mxu0 %v3083_v63  ;;  %v1790_v12 = vrot.slane %v1788_v21, 4  ;;  %v3105_v21 = vld [vmem:[#allocation2 + $0x228] sm:$0xff]  }
  0xa2   : > { %2833 = vmatmul.mubr.bf16.gmra.mrb[4].mxu0 %v3092_v13  ;;  %v1776_v5 = vrot.slane %v1774_v31, 4  ;;  %v1793_v13 = vrot.slane %v1791_v45, 5  ;;  %v3106_v45 = vld [vmem:[#allocation2 + $0x230] sm:$0xff]  }
  0xa3   : > { %2841 = vmatpush3.bf16.msra.mxu0 %v3083_v63  ;;  %2852 = vmatprep.mubr.bf16.mxu0 %v2512_v60  ;;  %v1767_v63 = vrot.slane %v1766_v46, 4  ;;  %v1744_v60 = vsel %vm3381_vm2, %v1739_v24, %v1743_v25  ;;  %v3104_v46 = vld [vmem:[#allocation2 + $0x220] sm:$0xff]   ;;  %v2009_v24 = vrot.slane %v3634_v58, 5  ;;  %v1989_v58 = vrot.slane %v3613_v44, 5 }
  0xa4   : > { %2747 = vmatpush3.bf16.msra.mxu1 %v3084_v33  ;;  %2842 = vmatprep.subr.bf16.mxu0 %v3085_v57  ;;  %v1771_v33 = vrot.slane %v1769_v10, 5  ;;  %v1794_v38 = vor.u32 %v1793_v13, %v1790_v12  ;;  %v1993_v13 = vrot.slane %v3616_v48, 5 }
  0xa5   : > { %2748 = vmatprep.subr.bf16.mxu1 %v3086_v39 }
  0xa6   : > { %v1772_v7 = vsel %vm3381_vm2, %v1767_v63, %v1771_v33  ;;  %v1795_v56 = vrot.slane %v1794_v38, 4  ;;  %v2526_v33 = vld [vmem:[%s3351_s26 + $0x20] sm:$0xe] }
  0xa7   : > { %2843 = vmatpush3.bf16.msra.mxu0 %v3085_v57  ;;  %v1730_v57 = vsel %vm3381_vm2, %v1725_v22, %v1729_v23  ;;  %v2531_v22 = vld [vmem:[%s3351_s26 + $0x48] sm:$0xe]  ;;  %v2005_v23 = vrot.slane %v3631_v11, 5  ;;  %v2534_v11 = vrot.slane %v2526_v33, 9 }
  0xa8   : > { %2749 = vmatpush3.bf16.msra.mxu1 %v3086_v39  ;;  %2844 = vmatprep.subr.bf16.mxu0 %v3087_v20  ;;  %v2528_v39 = vld [vmem:[%s3351_s26 + $0x30] sm:$0xe]  ;;  %v2513_v0 = vcombine.low %v1730_v57, %v1744_v60  ;;  %v1800_v31 = vsel %vm3381_vm2, %v1795_v56, %v1799_v2  ;;  %v2539_v27 = vrot.slane %v2531_v22, 9 }
  0xa9   : > { %2750 = vmatprep.subr.bf16.mxu1 %v3088_v49 }
  0xab   : > { %2845 = vmatpush3.bf16.msra.mxu0 %v3087_v20  ;;  %v1780_v20 = vor.u32 %v1779_v37, %v1776_v5  ;;  %v2527_v5 = vld [vmem:[%s3351_s26 + $0x28] sm:$0xe]  ;;  %v2010_v37 = vsel %vm3507_vm5, %v2539_v27, %v2009_v24 }
  0xac   : > { %2751 = vmatpush3.bf16.msra.mxu1 %v3088_v49  ;;  %2846 = vmatprep.subr.bf16.mxu0 %v3089_v51  ;;  %v2536_v49 = vrot.slane %v2528_v39, 9  ;;  %v2535_v12 = vrot.slane %v2527_v5, 9 }
  0xad   : > { %2752 = vmatprep.subr.bf16.mxu1 %v3091_v50  ;;  %v1781_v26 = vrot.slane %v1780_v20, 4 }
  0xae   : > { %v1998_v1 = vsel %vm3507_vm5, %v2536_v49, %v1997_v61  ;;  %v1994_v39 = vsel %vm3507_vm5, %v2535_v12, %v1993_v13 }
  0xaf   : > { %2847 = vmatpush3.bf16.msra.mxu0 %v3089_v51  ;;  %v2524_v51 = vld [vmem:[%s3351_s26 + $0x10] sm:$0xe]  ;;  %v2542_v10 = vcombine.low %v1998_v1, %v2002_v54  ;;  %v1786_v16 = vsel %vm3381_vm2, %v1781_v26, %v1785_v55 }
  0xb0   : > { %2753 = vmatpush3.bf16.msra.mxu1 %v3091_v50  ;;  %2848 = vmatprep.subr.bf16.mxu0 %v3093_v18  ;;  %v2514_v50 = vcombine.low %v1758_v29, %v1772_v7  ;;  %v2532_v28 = vrot.slane %v2524_v51, 9 }
  0xb1   : > { %2754 = vmatprep.subr.bf16.mxu1 %v3094_v52 }
  0xb2   : > { %v1982_v4 = vsel %vm3507_vm5, %v2532_v28, %v1981_v36 }
  0xb3   : > { %2849 = vmatpush3.bf16.msra.mxu0 %v3093_v18  ;;  %v2515_v18 = vcombine.low %v1786_v16, %v1800_v31  ;;  %v2540_v35 = vcombine.low %v1982_v4, %v1986_v6 }
  0xb4   : > { %2755 = vmatpush3.bf16.msra.mxu1 %v3094_v52  ;;  %2850 = vmatprep.subr.bf16.mxu0 %v3095_v40  ;;  %v2530_v52 = vld [vmem:[%s3351_s26 + $0x40] sm:$0xe] }
  0xb5   : > { %2884 = vmatprep.subr.bf16.mxu1 %v3098_v59  ;;  %v2538_v25 = vrot.slane %v2530_v52, 9 }
  0xb7   : > { %2757 = vmatmul.mubr.bf16.vlgmr.msra.gmra.mrb[0].mxu1 %v3097_v34  ;;  %2851 = vmatpush3.bf16.msra.mxu0 %v3095_v40  ;;  %v2006_v63 = vsel %vm3507_vm5, %v2538_v25, %v2005_v23  ;;  %v1990_v40 = vsel %vm3507_vm5, %v2534_v11, %v1989_v58 }
  0xb8   : > { %2892 = vmatpush3.bf16.msra.mxu1 %v3098_v59  ;;  %2760 = vmatprep.mubr.bf16.mxu1 %v3100_v43  ;;  %v2541_v32 = vcombine.low %v1990_v40, %v1994_v39 }
  0xb9   : > { %2885 = vmatprep.subr.bf16.mxu1 %v3099_v47  ;;  %2860 = vmatprep.subr.bf16.mxu0 %v3098_v59 }
  0xba   : > { %2853 = vmatmul.mubr.bf16.vlgmr.msra.gmra.mrb[0].mxu0 %v2513_v0 }
  0xbb   : > { %2861 = vmatpush3.bf16.msra.mxu0 %v3098_v59  ;;  %2856 = vmatprep.mubr.bf16.mxu0 %v2514_v50  ;;  %v2543_v59 = vcombine.low %v2006_v63, %v2010_v37 }
  0xbc   : > { %2893 = vmatpush3.bf16.msra.mxu1 %v3099_v47  ;;  %2862 = vmatprep.subr.bf16.mxu0 %v3099_v47 }
  0xbd   : > { %2886 = vmatprep.subr.bf16.mxu1 %v3102_v8 }
  0xbf   : > { %2761 = vmatmul.mubr.bf16.gmra.mrb[4].mxu1 %v3101_v62  ;;  %2863 = vmatpush3.bf16.msra.mxu0 %v3099_v47 }
  0xc0   : > { %2894 = vmatpush3.bf16.msra.mxu1 %v3102_v8  ;;  %2880 = vmatprep.mubr.bf16.mxu1 %v2542_v10 }
  0xc1   : > { %2887 = vmatprep.subr.bf16.mxu1 %v3103_v15  ;;  %2864 = vmatprep.subr.bf16.mxu0 %v3102_v8 }
  0xc2   : > { %2857 = vmatmul.mubr.bf16.gmra.mrb[4].mxu0 %v2515_v18 }
  0xc3   : > { %2865 = vmatpush3.bf16.msra.mxu0 %v3102_v8  ;;  %2876 = vmatprep.mubr.bf16.mxu0 %v2540_v35 }
  0xc4   : > { %2895 = vmatpush3.bf16.msra.mxu1 %v3103_v15  ;;  %2866 = vmatprep.subr.bf16.mxu0 %v3103_v15 }
  0xc5   : > { %2888 = vmatprep.subr.bf16.mxu1 %v3104_v46 }
  0xc7   : > { %2867 = vmatpush3.bf16.msra.mxu0 %v3103_v15 }
  0xc8   : > { %2896 = vmatpush3.bf16.msra.mxu1 %v3104_v46  ;;  %2868 = vmatprep.subr.bf16.mxu0 %v3104_v46 }
  0xc9   : > { %2889 = vmatprep.subr.bf16.mxu1 %v3105_v21 }
  0xcb   : > { %2869 = vmatpush3.bf16.msra.mxu0 %v3104_v46 }
  0xcc   : > { %2897 = vmatpush3.bf16.msra.mxu1 %v3105_v21  ;;  %2870 = vmatprep.subr.bf16.mxu0 %v3105_v21 }
  0xcd   : > { %2890 = vmatprep.subr.bf16.mxu1 %v3106_v45 }
  0xcf   : > { %2871 = vmatpush3.bf16.msra.mxu0 %v3105_v21 }
  0xd0   : > { %2898 = vmatpush3.bf16.msra.mxu1 %v3106_v45  ;;  %2872 = vmatprep.subr.bf16.mxu0 %v3106_v45 }
  0xd1   : > { %2891 = vmatprep.subr.bf16.mxu1 %v3107_v30 }
  0xd3   : > { %2873 = vmatpush3.bf16.msra.mxu0 %v3106_v45 }
  0xd4   : > { %2899 = vmatpush3.bf16.msra.mxu1 %v3107_v30  ;;  %2874 = vmatprep.subr.bf16.mxu0 %v3107_v30 }
  0xd7   : > { %2881 = vmatmul.mubr.bf16.vlgmr.msra.gmra.mrb[8].mxu1 %v2543_v59  ;;  %2875 = vmatpush3.bf16.msra.mxu0 %v3107_v30 }
  0xda   : > { %2877 = vmatmul.mubr.bf16.vlgmr.msra.gmra.mrb[0].mxu0 %v2541_v32 }
 0x18a   : > { %v2758_v34 = vpop.f32.mrb[0].mxu1 }
 0x18b   : > { %v971_v44 = vpop.f32.mrb[1].mxu1 }
 0x18c   : > { %v2759_v57 = vpop.f32.mrb[2].mxu1 }
 0x18d   : > { %v974_v48 = vpop.f32.mrb[3].mxu1 }
 0x192   : > { %v2762_v60 = vpop.f32.mrb[4].mxu1 }
 0x193   : > { %v987_v41 = vpop.f32.mrb[5].mxu1 }
 0x194   : > { %v2763_v42 = vpop.f32.mrb[6].mxu1 }
 0x195   : > { %v990_v43 = vpop.f32.mrb[7].mxu1  ;;  %v2858_v29 = vpop.f32.mrb[4].mxu0 }
 0x196   : > { %v2904_v7 = vadd.f32 %v2858_v29, %v2762_v60  ;;  %v1932_v20 = vpop.f32.mrb[5].mxu0 }
 0x197   : > { %v2906_v38 = vadd.f32 %v1932_v20, %v987_v41  ;;  %v2859_v19 = vpop.f32.mrb[6].mxu0 }
 0x198   : > { %v2908_v47 = vadd.f32 %v2859_v19, %v2763_v42  ;;  %v1935_v49 = vpop.f32.mrb[7].mxu0 }
 0x199   : > { %v2910_v61 = vadd.f32 %v1935_v49, %v990_v43 }
 0x1aa   : > { %v2882_v3 = vpop.f32.mrb[8].mxu1 }
 0x1ab   : > { %v3689_v53 = vadd.f32 %v2904_v7, %v2882_v3  ;;  %v2142_v0 = vpop.f32.mrb[9].mxu1 }
 0x1ac   : > { %v3691_v50 = vadd.f32 %v2906_v38, %v2142_v0  ;;  %v2883_v55 = vpop.f32.mrb[10].mxu1 }
 0x1ad   : > { %2207 = vst [vmem:[%s182_s29 + $0x30] sm:$0xff] %v3689_v53  ;;  %v3694_v2 = vadd.f32 %v2908_v47, %v2883_v55  ;;  %v2145_v51 = vpop.f32.mrb[11].mxu1  ;;  %v2878_v26 = vpop.f32.mrb[0].mxu0 }
 0x1ae   : > { %2205 = vst [vmem:[%s182_s29 + $0x20] sm:$0xff] %v3691_v50  ;;  %v2911_v14 = vadd.f32 %v2910_v61, %v2145_v51  ;;  %v2900_v56 = vadd.f32 %v2878_v26, %v2758_v34  ;;  %v2126_v1 = vpop.f32.mrb[1].mxu0 }
 0x1af   : > { %2208 = vst [vmem:[%s182_s29 + $0x38] sm:$0xff] %v3694_v2  ;;  %v2901_v54 = vadd.f32 %v2126_v1, %v971_v44  ;;  %v2879_v8 = vpop.f32.mrb[2].mxu0 }
 0x1b0   : > { %2206 = vst [vmem:[%s182_s29 + $0x28] sm:$0xff] %v2911_v14  ;;  %2203 = vst [vmem:[%s182_s29 + $0x10] sm:$0xff] %v2900_v56  ;;  %v2902_v62 = vadd.f32 %v2879_v8, %v2759_v57  ;;  %v2129_v28 = vpop.f32.mrb[3].mxu0 }
 0x1b1   : > { %2201 = vst [vmem:[%s182_s29] sm:$0xff] %v2901_v54  ;;  %v2903_v36 = vadd.f32 %v2129_v28, %v974_v48  ;;  %v2179_v9 = vmul.f32 %v2901_v54, %v2901_v54 }
 0x1b2   : > { %2204 = vst [vmem:[%s182_s29 + $0x18] sm:$0xff] %v2902_v62 }
 0x1b3   : > { %v2165_v17 = vadd.f32 %v2903_v36, %v2901_v54  ;;  %v2180_v10 = vmul.f32 %v2903_v36, %v2903_v36  ;;  %2202 = vst [vmem:[%s182_s29 + $0x8] sm:$0xff] %v2903_v36 }
 0x1b4   : > { %3149 = shalt.err (!%p3146_p7)
}
 0x1b5   : > { %s3150_s19 = scalar_lea.hbm %s3704_s7, 1024  ;;  %s3154_s25 = scalar_lea.hbm %s3789_s2, 2048 }
 0x1b6   : > { %p3151_p8 = scmp.ne.s32.totalorder %s3704_s7, %s3150_s19  ;;  %p3155_p1 = scmp.lt.u32.totalorder %s3704_s7, %s3789_s2 }
 0x1b7   : > { %p3156_p0 = scmp.lt.u32.totalorder %s3154_s25, %s3150_s19  ;;  %p3158_p6 = scmp.lt.u32.totalorder %s3150_s19, %s3704_s7 }
 0x1b8   : > { %p3152_p11 = pnand %p3151_p8, %p3805_p9 }
 0x1b9   : > { %p3157_p5 = por %p3156_p0, %p3155_p1 }
 0x1ba   : > { %p3153_p13 = pneg %p3152_p11 }
 0x1bb   : > { %p3159_p10 = por %p3158_p6, %p3157_p5 }
 0x1bd   : > { %p3160_p12 = pnand %p3159_p10, %p3153_p13 }
 0x1bf   : > { %3163 = shalt.err (!%p3160_p12)
}
 0x1c0   : > { %s3240_s29 = smov 128   ;;  %s3241_s4 = smov 8   ;;  %v2181_v16 = vmul.f32 %v2900_v56, %v2900_v56  ;;  %v2166_v31 = vadd.f32 %v2900_v56, %v2165_v17  ;;  %v2187_v15 = vadd.f32 %v2180_v10, %v2179_v9  ;;  %v2182_v4 = vmul.f32 %v2902_v62, %v2902_v62 }
 0x1c1   : > { %2969 = dma.vmem_to_hbm [thread:$0]  (%p3805_p9), %s3699_s30, 1024, %s3704_s7, %s2210_s8, %s3240_s29, %s3240_s29, %s3241_s4   ;;  %v2183_v46 = vmul.f32 %v3691_v50, %v3691_v50  ;;  %v2184_v52 = vmul.f32 %v2911_v14, %v2911_v14  ;;  %v2185_v23 = vmul.f32 %v3689_v53, %v3689_v53  ;;  %v2186_v27 = vmul.f32 %v3694_v2, %v3694_v2 }
 0x1c2   : > { %v2188_v6 = vadd.f32 %v2187_v15, %v2181_v16  ;;  %v2167_v18 = vadd.f32 %v2902_v62, %v2166_v31  ;;  %s2354_s30 = sshll.u32 %s3686_s27, 1  ;;  %s2556_s5 = sshll.u32 %s3284_s16, 5 }
 0x1c3   : > { %s189_s6 = scalar_lea.vmem [#allocation6], %s2354_s30  ;;  %s3744_s10 = scalar_lea.hbm %s3790_s3, %s2556_s5 }
 0x1c4   : > { %v2168_v35 = vadd.f32 %v3691_v50, %v2167_v18  ;;  %v2189_v21 = vadd.f32 %v2188_v6, %v2182_v4  ;;  %s2244_s7 = sshll.u32 %s189_s6, 4  ;;  %s2215_s11 = scalar_lea.sflag [#allocation7], %s3686_s27  ;;  %s3746_s7 = int_to_ptr.vmem [resolvable:$true] %s2244_s7 }
 0x1c5   : > { %s3164_s17 = scalar_lea.vmem %s3746_s7, 32  ;;  %s3242_s16 = smov [#allocation6]  }
 0x1c6   : > { %v2169_v45 = vadd.f32 %v2911_v14, %v2168_v35  ;;  %v2190_v22 = vadd.f32 %v2189_v21, %v2183_v46  ;;  %p3165_p2 = scmp.ne.s32.totalorder %s3746_s7, %s3164_s17  ;;  %s3168_s19 = sshll.u32 %s3242_s16, 4  ;;  %s3169_s19 = int_to_ptr.vmem [resolvable:$false] %s3168_s19 }
 0x1c7   : > { %s3170_s20 = scalar_lea.vmem %s3169_s19, 64  ;;  %p3171_p7 = scmp.lt.s32.totalorder %s3746_s7, %s3169_s19 }
 0x1c8   : > { %v2170_v24 = vadd.f32 %v3689_v53, %v2169_v45  ;;  %v2191_v25 = vadd.f32 %v2190_v22, %v2184_v52  ;;  %p3166_p3 = pnand %p3165_p2, %p3805_p9  ;;  %p3172_p8 = scmp.lt.s32.totalorder %s3170_s20, %s3164_s17 }
 0x1ca   : > { %v2171_v30 = vadd.f32 %v3694_v2, %v2170_v24  ;;  %v2192_v33 = vadd.f32 %v2191_v25, %v2185_v23  ;;  %p3167_p4 = pneg %p3166_p3  ;;  %p3173_p11 = por %p3172_p8, %p3171_p7 }
 0x1cc   : > { %v2172_v5 = vrot.slane %v2171_v30, 4  ;;  %v2193_v63 = vadd.f32 %v2192_v33, %v2186_v27  ;;  %p3174_p13 = pnand %p3173_p11, %p3167_p4 }
 0x1ce   : > { %v2173_v37 = vadd.f32 %v2172_v5, %v2171_v30  ;;  %v2194_v11 = vrot.slane %v2193_v63, 4 }
 0x1d0   : > { %v2174_v58 = vrot.slane %v2173_v37, 2  ;;  %v2195_v12 = vadd.f32 %v2194_v11, %v2193_v63 }
 0x1d2   : > { %v2175_v13 = vadd.f32 %v2174_v58, %v2173_v37  ;;  %v2196_v59 = vrot.slane %v2195_v12, 2 }
 0x1d4   : > { %v2176_v40 = vrot.slane %v2175_v13, 1  ;;  %v2197_v39 = vadd.f32 %v2196_v59, %v2195_v12 }
 0x1d6   : > { %v2177_v32 = vadd.f32 %v2176_v40, %v2175_v13  ;;  %v2198_v34 = vrot.slane %v2197_v39, 1 }
 0x1d8   : > { %2178 = vst [vmem:[%s189_s6] sm:$0x1] %v2177_v32  ;;  %v2199_v44 = vadd.f32 %v2198_v34, %v2197_v39 }
 0x1da   : > { %2200 = vst [vmem:[%s189_s6 + $0x1] sm:$0x1] %v2199_v44 }
 0x1db   : > { %3177 = shalt.err (!%p3174_p13)
}
 0x1dc   : > { %s3178_s27 = scalar_lea.hbm %s3744_s10, 32  ;;  %s3182_s26 = scalar_lea.hbm %s3790_s3, 64 }
 0x1dd   : > { %p3179_p1 = scmp.ne.s32.totalorder %s3744_s10, %s3178_s27  ;;  %p3183_p6 = scmp.lt.u32.totalorder %s3744_s10, %s3790_s3 }
 0x1de   : > { %p3184_p10 = scmp.lt.u32.totalorder %s3182_s26, %s3178_s27  ;;  %p3186_p2 = scmp.lt.u32.totalorder %s3178_s27, %s3744_s10 }
 0x1df   : > { %p3180_p0 = pnand %p3179_p1, %p3805_p9 }
 0x1e0   : > { %p3185_p12 = por %p3184_p10, %p3183_p6 }
 0x1e1   : > { %p3181_p5 = pneg %p3180_p0 }
 0x1e2   : > { %p3187_p3 = por %p3186_p2, %p3185_p12 }
 0x1e4   : > { %p3188_p4 = pnand %p3187_p3, %p3181_p5 }
 0x1e6   : > { %3191 = shalt.err (!%p3188_p4)
}
 0x1e7   : > { %2970 = dma.vmem_to_hbm [thread:$0]  (%p3805_p9), %s3746_s7, 32, %s3744_s10, %s2215_s11  }
 0x1e8 PF: > { %p2986_p7 = scmp.ge.s32.totalorder %s3234_s15, 2  ;;  %s2256_s4 = sand.u32 1, %s3222_s12  }
 0x1e9   : > { %p3806_p8 = scmp.ne.s32.totalorder %s3795_s23, 0  ;;  %s2257_s30 = scalar_lea.sflag [#allocation4], %s2256_s4 }
 0x1eb   : > { %p2978_p11 = pnand %p2986_p7, %p3806_p8 }
 0x1ed   : > { %3213 = dma.done.wait (!%p2978_p11), %s2257_s30, 1024  }
 0x1ee   : > { %3215 = vsyncadd (!%p2978_p11), %s2257_s30, 4294966272  ;;  %s2266_s5 = scalar_lea.sflag [#allocation7], %s2256_s4 }
 0x1ef   : > { %3217 = dma.done.wait (!%p2978_p11), %s2266_s5, 32  }
 0x1f0   : > { %3219 = vsyncadd (!%p2978_p11), %s2266_s5, 4294967264  ;;  %p18_p9 = scmp.ge.s32.totalorder %s3288_s18, 4   ;;  %s3807_s12 = smov %s3226_s13 }
 0x1f1   : > { %s3808_s13 = smov %s3230_s14  ;;  %s3809_s14 = smov %s3299_s21 }
 0x1f2   : > { %s3810_s15 = smov %s3288_s18  ;;  %20 = sbr.rel (!%p18_p9) target bundleno = 6 (0x6), region = 95 }
 0x1f9   :  { %2271 = vsyncpa [#allocation3], 1 }
 0x1fa   :  { %2273 = vsyncpa [#allocation3 + $0x1], 1 }
 0x1fb   :  { %2274 = vsyncpa [#allocation4], 1 }
 0x1fc   :  { %2276 = vsyncpa [#allocation4 + $0x1], 1 }
 0x1fd   :  { %2277 = vsyncpa [#allocation7], 1 }
 0x1fe   :  { %2279 = vsyncpa [#allocation7 + $0x1], 1 }

</bundles_post_ra>
